<compile_context>
chip_gen: v7x
topology: tpu7x:2x2x1
jax: 0.10.0
libtpu: 0.0.40
codegen_flags: <defaults>
</compile_context>

<pallas_src>
import functools

import jax
import jax.numpy as jnp
from jax.experimental import pallas as pl
from jax.experimental.pallas import tpu as pltpu

# ----------------------------- model config ---------------------------------
EMBED = 32
HEADS = 4
HEAD_DIM = EMBED // HEADS
FWD_EXP = 4
HIDDEN = FWD_EXP * EMBED
LN_EPS = 1e-5


# ----------------------------- kernel helpers --------------------------------
def _layer_norm(x, gamma, beta):
    mu = jnp.mean(x, axis=-1, keepdims=True)
    var = jnp.mean((x - mu) ** 2, axis=-1, keepdims=True)
    return (x - mu) * jax.lax.rsqrt(var + LN_EPS) * gamma + beta


def _mha(xq, xk, xv, bias, wq, wk, wvo, fcb, n, lq, lk):
    """Multi-head attention with fc_out folded in, batched over the batch dim n.

    xq: (n*lq, E) query tokens; xk/xv: (n*lk, E) key/value tokens (flattened rows).
    wq (scale pre-folded), wk: block-diagonal pre-transposed (E, E) projections.
    wvo: (E, E) whose rows hD:(h+1)D equal wv^T @ fc_w^T[hD:(h+1)D, :]  (value proj
         fused with that head's slice of fc_out), so head outputs are summed — no
         lane concatenate and no separate fc matmul.
    bias: additive mask bias, (n, lq, lk) or (n, 1, lk).
    Returns (n*lq, E).
    """
    qp = jnp.dot(xq, wq, preferred_element_type=jnp.float32).reshape(n, lq, EMBED)
    kp = jnp.dot(xk, wk, preferred_element_type=jnp.float32).reshape(n, lk, EMBED)

    out = jnp.zeros((n, lq, EMBED), jnp.float32)
    for h in range(HEADS):
        sl = slice(h * HEAD_DIM, (h + 1) * HEAD_DIM)
        # scores for this head, batched over n (scale already folded into wq)
        energy = jnp.einsum("nqd,nkd->nqk", qp[:, :, sl], kp[:, :, sl],
                            preferred_element_type=jnp.float32) + bias
        m = jnp.max(energy, axis=-1, keepdims=True)
        e = jnp.exp(energy - m)
        attn = e / jnp.sum(e, axis=-1, keepdims=True)
        # value projection fused with this head's fc_out slice: (n*lk, D) @ (D, E)
        vo = jnp.dot(xv[:, sl], wvo[sl, :],
                     preferred_element_type=jnp.float32).reshape(n, lk, EMBED)
        out = out + jnp.einsum("nqk,nke->nqe", attn, vo,
                               preferred_element_type=jnp.float32)
    return out.reshape(n * lq, EMBED) + fcb


# --------------------------- fused decoder kernel -----------------------------
def fused_decoder_kernel(x_ref, val_ref, key_ref, tb_ref, sb_ref,
                         dwq_ref, dwk_ref, dwvo_ref, dfcb_ref, dg_ref, db_ref,
                         twq_ref, twk_ref, twvo_ref, tfcb_ref, n1g_ref, n1b_ref,
                         w1_ref, b1_ref, w2_ref, b2_ref, n2g_ref, n2b_ref,
                         o_ref, *, n, lq, lk):
    x = x_ref[...]        # (n*lq, E) target tokens
    v_in = val_ref[...]   # (n*lk, E) encoder value
    k_in = key_ref[...]   # (n*lk, E) encoder key

    # 1) masked decoder self-attention (+ folded fc_out) + residual + LayerNorm
    a1 = _mha(x, x, x, tb_ref[...],
              dwq_ref[...], dwk_ref[...], dwvo_ref[...], dfcb_ref[...], n, lq, lq)
    # TODO(synk): nn.Dropout is identity (eval mode); no in-kernel RNG dropout applied.
    q = _layer_norm(a1 + x, dg_ref[...], db_ref[...])

    # 2) encoder-decoder cross-attention (+ folded fc_out) + residual + LayerNorm
    a2 = _mha(q, k_in, v_in, sb_ref[...],
              twq_ref[...], twk_ref[...], twvo_ref[...], tfcb_ref[...], n, lq, lk)
    x2 = _layer_norm(a2 + q, n1g_ref[...], n1b_ref[...])

    # 3) FFN: Linear -> ReLU -> Linear, then residual + LayerNorm
    h = jnp.maximum(
        jnp.dot(x2, w1_ref[...], preferred_element_type=jnp.float32) + b1_ref[...],
        0.0)
    f = jnp.dot(h, w2_ref[...], preferred_element_type=jnp.float32) + b2_ref[...]
    o_ref[...] = _layer_norm(f + x2, n2g_ref[...], n2b_ref[...])


# ------------------------------ host wrapper ----------------------------------
def _block_diag_heads(w):
    """Fold the shared per-head (D,D) nn.Linear weight into a block-diagonal,
    pre-transposed (E,E) matrix so that x(L,E) @ Wbig applies it per head."""
    eye = jnp.eye(HEADS, dtype=jnp.float32)
    return jnp.einsum("ij,ab->iajb", eye, w.T).reshape(EMBED, EMBED)


def decoder_block_forward(x, value, key, src_mask, trg_mask, p):
    N, Lq, E = x.shape
    Lk = key.shape[1]
    scale = 1.0 / float(E) ** 0.5
    NEG = jnp.float32(-1e20)

    # flatten token rows: the whole batch is processed in one kernel invocation
    x2 = x.reshape(N * Lq, E)
    v2 = value.reshape(N * Lk, E)
    k2 = key.reshape(N * Lk, E)

    # additive mask biases (0 where attended, -1e20 where masked) — masks stay runtime
    # inputs (module semantics); only the compare+select is hoisted out of the kernel.
    t_bias = jnp.where(trg_mask.reshape(N, Lq, Lq) == 0, NEG, 0.0).astype(jnp.float32)
    s_bias = jnp.where(src_mask.reshape(N, 1, Lk) == 0, NEG, 0.0).astype(jnp.float32)

    def prep_attn(a):
        wq = _block_diag_heads(a["wq"]) * scale          # fold 1/sqrt(E) into Q proj
        wk = _block_diag_heads(a["wk"])
        wvo = _block_diag_heads(a["wv"]) @ a["fc_w"].T   # fold fc_out into V proj rows
        return wq, wk, wvo, a["fc_b"]

    dwq, dwk, dwvo, dfcb = prep_attn(p["dec_attn"])
    twq, twk, twvo, tfcb = prep_attn(p["tb_attn"])

    args = (x2, v2, k2, t_bias, s_bias,
            dwq, dwk, dwvo, dfcb, p["dec_norm"]["g"], p["dec_norm"]["b"],
            twq, twk, twvo, tfcb, p["tb_norm1"]["g"], p["tb_norm1"]["b"],
            p["ffn"]["w1"].T, p["ffn"]["b1"], p["ffn"]["w2"].T, p["ffn"]["b2"],
            p["tb_norm2"]["g"], p["tb_norm2"]["b"])

    vm = pl.BlockSpec(memory_space=pltpu.MemorySpace.VMEM)   # whole array, VMEM-resident
    out2 = pl.pallas_call(
        functools.partial(fused_decoder_kernel, n=N, lq=Lq, lk=Lk),
        out_shape=jax.ShapeDtypeStruct((N * Lq, E), jnp.float32),
        in_specs=[vm] * len(args),
        out_specs=vm,
    )(*args)
    return out2.reshape(N, Lq, E)


# --------------------------- pure-JAX reference -------------------------------
def _ref_ln(x, g, b):
    mu = x.mean(-1, keepdims=True)
    var = ((x - mu) ** 2).mean(-1, keepdims=True)
    return (x - mu) / jnp.sqrt(var + LN_EPS) * g + b


def _ref_self_attention(values, keys, query, mask, p):
    N, vlen, E = values.shape
    klen, qlen = keys.shape[1], query.shape[1]
    D = E // HEADS
    v = values.reshape(N, vlen, HEADS, D) @ p["wv"].T
    k = keys.reshape(N, klen, HEADS, D) @ p["wk"].T
    q = query.reshape(N, qlen, HEADS, D) @ p["wq"].T
    energy = jnp.einsum("nqhd,nkhd->nhqk", q, k)
    energy = jnp.where(mask == 0, -1e20, energy)
    attn = jax.nn.softmax(energy / float(E) ** 0.5, axis=3)
    out = jnp.einsum("nhql,nlhd->nqhd", attn, v).reshape(N, qlen, E)
    return out @ p["fc_w"].T + p["fc_b"]


def ref_decoder_block(x, value, key, src_mask, trg_mask, p):
    attn = _ref_self_attention(x, x, x, trg_mask, p["dec_attn"])
    query = _ref_ln(attn + x, p["dec_norm"]["g"], p["dec_norm"]["b"])
    attn2 = _ref_self_attention(value, key, query, src_mask, p["tb_attn"])
    x2 = _ref_ln(attn2 + query, p["tb_norm1"]["g"], p["tb_norm1"]["b"])
    fwd = jnp.maximum(x2 @ p["ffn"]["w1"].T + p["ffn"]["b1"], 0.0) @ p["ffn"]["w2"].T \
        + p["ffn"]["b2"]
    return _ref_ln(fwd + x2, p["tb_norm2"]["g"], p["tb_norm2"]["b"])


# ------------------------------ parameters ------------------------------------
def init_params(key):
    ks = iter(jax.random.split(key, 32))

    def w(shape, scale=0.1):
        return (scale * jax.random.normal(next(ks), shape)).astype(jnp.float32)

    def attn_params():
        return {
            "wv": w((HEAD_DIM, HEAD_DIM)),
            "wk": w((HEAD_DIM, HEAD_DIM)),
            "wq": w((HEAD_DIM, HEAD_DIM)),
            "fc_w": w((EMBED, EMBED)),
            "fc_b": w((1, EMBED), 0.05),
        }

    def ln_params():
        return {"g": 1.0 + w((1, EMBED), 0.05), "b": w((1, EMBED), 0.05)}

    return {
        "dec_attn": attn_params(),
        "dec_norm": ln_params(),
        "tb_attn": attn_params(),
        "tb_norm1": ln_params(),
        "tb_norm2": ln_params(),
        "ffn": {
            "w1": w((HIDDEN, EMBED)),
            "b1": w((1, HIDDEN), 0.05),
            "w2": w((EMBED, HIDDEN)),
            "b2": w((1, EMBED), 0.05),
        },
    }


# --------------------------------- main ---------------------------------------
if __name__ == "__main__":
    N, L_TRG, L_SRC = 2, 8, 8

    root = jax.random.PRNGKey(0)
    k_p, k_x, k_v, k_k = jax.random.split(root, 4)

    params = init_params(k_p)
    x = jax.random.normal(k_x, (N, L_TRG, EMBED), dtype=jnp.float32)
    value = jax.random.normal(k_v, (N, L_SRC, EMBED), dtype=jnp.float32)
    key = jax.random.normal(k_k, (N, L_SRC, EMBED), dtype=jnp.float32)

    # causal target mask (N, 1, Lq, Lq); full source mask (N, 1, 1, Lk)
    trg_mask = jnp.broadcast_to(
        jnp.tril(jnp.ones((L_TRG, L_TRG), jnp.float32))[None, None],
        (N, 1, L_TRG, L_TRG))
    src_mask = jnp.ones((N, 1, 1, L_SRC), jnp.float32)

    out = jax.jit(decoder_block_forward)(x, value, key, src_mask, trg_mask, params)
    out = jax.block_until_ready(out)

    ref = ref_decoder_block(x, value, key, src_mask, trg_mask, params)
    assert out.shape == (N, L_TRG, EMBED)
    assert jnp.allclose(out, ref, atol=1e-4, rtol=1e-4), "mismatch vs reference"

    print("KERNEL_OK")
</pallas_src>

<mosaic_0001>
module attributes {stable_mosaic.version = 11 : i64} {
  func.func @fused_decoder_kernel(%arg0: memref<16x32xf32, #tpu.memory_space<vmem>>, %arg1: memref<16x32xf32, #tpu.memory_space<vmem>>, %arg2: memref<16x32xf32, #tpu.memory_space<vmem>>, %arg3: memref<2x8x8xf32, #tpu.memory_space<vmem>>, %arg4: memref<2x1x8xf32, #tpu.memory_space<vmem>>, %arg5: memref<32x32xf32, #tpu.memory_space<vmem>>, %arg6: memref<32x32xf32, #tpu.memory_space<vmem>>, %arg7: memref<32x32xf32, #tpu.memory_space<vmem>>, %arg8: memref<1x32xf32, #tpu.memory_space<vmem>>, %arg9: memref<1x32xf32, #tpu.memory_space<vmem>>, %arg10: memref<1x32xf32, #tpu.memory_space<vmem>>, %arg11: memref<32x32xf32, #tpu.memory_space<vmem>>, %arg12: memref<32x32xf32, #tpu.memory_space<vmem>>, %arg13: memref<32x32xf32, #tpu.memory_space<vmem>>, %arg14: memref<1x32xf32, #tpu.memory_space<vmem>>, %arg15: memref<1x32xf32, #tpu.memory_space<vmem>>, %arg16: memref<1x32xf32, #tpu.memory_space<vmem>>, %arg17: memref<32x128xf32, #tpu.memory_space<vmem>>, %arg18: memref<1x128xf32, #tpu.memory_space<vmem>>, %arg19: memref<128x32xf32, #tpu.memory_space<vmem>>, %arg20: memref<1x32xf32, #tpu.memory_space<vmem>>, %arg21: memref<1x32xf32, #tpu.memory_space<vmem>>, %arg22: memref<1x32xf32, #tpu.memory_space<vmem>>, %arg23: memref<16x32xf32, #tpu.memory_space<vmem>>) attributes {dimension_semantics = [], scalar_prefetch = 0 : i64, scratch_operands = 0 : i64, tpu.core_type = #tpu.core_type<tc>} {
    %c0 = arith.constant 0 : index
    %c0_0 = arith.constant 0 : index
    %0 = vector.load %arg0[%c0, %c0_0] : memref<16x32xf32, #tpu.memory_space<vmem>>, vector<16x32xf32>
    %c0_1 = arith.constant 0 : index
    %c0_2 = arith.constant 0 : index
    %1 = vector.load %arg1[%c0_1, %c0_2] : memref<16x32xf32, #tpu.memory_space<vmem>>, vector<16x32xf32>
    %c0_3 = arith.constant 0 : index
    %c0_4 = arith.constant 0 : index
    %2 = vector.load %arg2[%c0_3, %c0_4] : memref<16x32xf32, #tpu.memory_space<vmem>>, vector<16x32xf32>
    %c0_5 = arith.constant 0 : index
    %c0_6 = arith.constant 0 : index
    %c0_7 = arith.constant 0 : index
    %3 = vector.load %arg3[%c0_5, %c0_6, %c0_7] : memref<2x8x8xf32, #tpu.memory_space<vmem>>, vector<2x8x8xf32>
    %c0_8 = arith.constant 0 : index
    %c0_9 = arith.constant 0 : index
    %4 = vector.load %arg5[%c0_8, %c0_9] : memref<32x32xf32, #tpu.memory_space<vmem>>, vector<32x32xf32>
    %c0_10 = arith.constant 0 : index
    %c0_11 = arith.constant 0 : index
    %5 = vector.load %arg6[%c0_10, %c0_11] : memref<32x32xf32, #tpu.memory_space<vmem>>, vector<32x32xf32>
    %c0_12 = arith.constant 0 : index
    %c0_13 = arith.constant 0 : index
    %6 = vector.load %arg7[%c0_12, %c0_13] : memref<32x32xf32, #tpu.memory_space<vmem>>, vector<32x32xf32>
    %c0_14 = arith.constant 0 : index
    %c0_15 = arith.constant 0 : index
    %7 = vector.load %arg8[%c0_14, %c0_15] : memref<1x32xf32, #tpu.memory_space<vmem>>, vector<1x32xf32>
    %cst = arith.constant dense<0.000000e+00> : vector<16x32xf32>
    %8 = tpu.matmul %0, %4, %cst {dimension_numbers = #tpu.dot_dimension_numbers<[1], [0], [0], [1], [0, 0, 1, 1], [], []>} : vector<16x32xf32>, vector<32x32xf32>, vector<16x32xf32> -> vector<16x32xf32>
    %9 = vector.shape_cast %8 : vector<16x32xf32> to vector<2x8x32xf32>
    %cst_16 = arith.constant dense<0.000000e+00> : vector<16x32xf32>
    %10 = tpu.matmul %0, %5, %cst_16 {dimension_numbers = #tpu.dot_dimension_numbers<[1], [0], [0], [1], [0, 0, 1, 1], [], []>} : vector<16x32xf32>, vector<32x32xf32>, vector<16x32xf32> -> vector<16x32xf32>
    %11 = vector.shape_cast %10 : vector<16x32xf32> to vector<2x8x32xf32>
    %cst_17 = arith.constant 0.000000e+00 : f32
    %12 = vector.broadcast %cst_17 : f32 to vector<2x8x32xf32>
    %13 = vector.extract_strided_slice %9 {offsets = [0, 0, 0], sizes = [2, 8, 8], strides = [1, 1, 1]} : vector<2x8x32xf32> to vector<2x8x8xf32>
    %14 = vector.extract_strided_slice %11 {offsets = [0, 0, 0], sizes = [2, 8, 8], strides = [1, 1, 1]} : vector<2x8x32xf32> to vector<2x8x8xf32>
    "tpu.trace_start"() <{level = 10 : i32, message = "nqd,nkd->nqk"}> : () -> ()
    %cst_18 = arith.constant dense<0.000000e+00> : vector<2x8x8xf32>
    %15 = tpu.matmul %13, %14, %cst_18 {dimension_numbers = #tpu.dot_dimension_numbers<[2], [2], [1], [1], [0, 0, 0, 1, 1, 1], [0], [0]>} : vector<2x8x8xf32>, vector<2x8x8xf32>, vector<2x8x8xf32> -> vector<2x8x8xf32>
    "tpu.trace_stop"() : () -> ()
    %16 = arith.addf %15, %3 : vector<2x8x8xf32>
    %cst_19 = arith.constant dense<0xFF800000> : vector<2x8xf32>
    %17 = vector.multi_reduction <maximumf>, %16, %cst_19 [2] : vector<2x8x8xf32> to vector<2x8xf32>
    %18 = vector.shape_cast %17 : vector<2x8xf32> to vector<2x8x1xf32>
    %19 = vector.broadcast %18 : vector<2x8x1xf32> to vector<2x8x8xf32>
    %20 = arith.subf %16, %19 : vector<2x8x8xf32>
    %21 = math.exp %20 : vector<2x8x8xf32>
    %cst_20 = arith.constant dense<0.000000e+00> : vector<2x8xf32>
    %22 = vector.multi_reduction <add>, %21, %cst_20 [2] : vector<2x8x8xf32> to vector<2x8xf32>
    %23 = vector.shape_cast %22 : vector<2x8xf32> to vector<2x8x1xf32>
    %24 = vector.broadcast %23 : vector<2x8x1xf32> to vector<2x8x8xf32>
    %25 = arith.divf %21, %24 : vector<2x8x8xf32>
    %26 = vector.extract_strided_slice %0 {offsets = [0, 0], sizes = [16, 8], strides = [1, 1]} : vector<16x32xf32> to vector<16x8xf32>
    %27 = vector.extract_strided_slice %6 {offsets = [0, 0], sizes = [8, 32], strides = [1, 1]} : vector<32x32xf32> to vector<8x32xf32>
    %cst_21 = arith.constant dense<0.000000e+00> : vector<16x32xf32>
    %28 = tpu.matmul %26, %27, %cst_21 {dimension_numbers = #tpu.dot_dimension_numbers<[1], [0], [0], [1], [0, 0, 1, 1], [], []>} : vector<16x8xf32>, vector<8x32xf32>, vector<16x32xf32> -> vector<16x32xf32>
    %29 = vector.shape_cast %28 : vector<16x32xf32> to vector<2x8x32xf32>
    "tpu.trace_start"() <{level = 10 : i32, message = "nqk,nke->nqe"}> : () -> ()
    %cst_22 = arith.constant dense<0.000000e+00> : vector<2x8x32xf32>
    %30 = tpu.matmul %25, %29, %cst_22 {dimension_numbers = #tpu.dot_dimension_numbers<[2], [1], [1], [2], [0, 0, 0, 1, 1, 2], [0], [0]>} : vector<2x8x8xf32>, vector<2x8x32xf32>, vector<2x8x32xf32> -> vector<2x8x32xf32>
    "tpu.trace_stop"() : () -> ()
    %31 = arith.addf %12, %30 : vector<2x8x32xf32>
    %32 = vector.extract_strided_slice %9 {offsets = [0, 0, 8], sizes = [2, 8, 8], strides = [1, 1, 1]} : vector<2x8x32xf32> to vector<2x8x8xf32>
    %33 = vector.extract_strided_slice %11 {offsets = [0, 0, 8], sizes = [2, 8, 8], strides = [1, 1, 1]} : vector<2x8x32xf32> to vector<2x8x8xf32>
    "tpu.trace_start"() <{level = 10 : i32, message = "nqd,nkd->nqk"}> : () -> ()
    %cst_23 = arith.constant dense<0.000000e+00> : vector<2x8x8xf32>
    %34 = tpu.matmul %32, %33, %cst_23 {dimension_numbers = #tpu.dot_dimension_numbers<[2], [2], [1], [1], [0, 0, 0, 1, 1, 1], [0], [0]>} : vector<2x8x8xf32>, vector<2x8x8xf32>, vector<2x8x8xf32> -> vector<2x8x8xf32>
    "tpu.trace_stop"() : () -> ()
    %35 = arith.addf %34, %3 : vector<2x8x8xf32>
    %cst_24 = arith.constant dense<0xFF800000> : vector<2x8xf32>
    %36 = vector.multi_reduction <maximumf>, %35, %cst_24 [2] : vector<2x8x8xf32> to vector<2x8xf32>
    %37 = vector.shape_cast %36 : vector<2x8xf32> to vector<2x8x1xf32>
    %38 = vector.broadcast %37 : vector<2x8x1xf32> to vector<2x8x8xf32>
    %39 = arith.subf %35, %38 : vector<2x8x8xf32>
    %40 = math.exp %39 : vector<2x8x8xf32>
    %cst_25 = arith.constant dense<0.000000e+00> : vector<2x8xf32>
    %41 = vector.multi_reduction <add>, %40, %cst_25 [2] : vector<2x8x8xf32> to vector<2x8xf32>
    %42 = vector.shape_cast %41 : vector<2x8xf32> to vector<2x8x1xf32>
    %43 = vector.broadcast %42 : vector<2x8x1xf32> to vector<2x8x8xf32>
    %44 = arith.divf %40, %43 : vector<2x8x8xf32>
    %45 = vector.extract_strided_slice %0 {offsets = [0, 8], sizes = [16, 8], strides = [1, 1]} : vector<16x32xf32> to vector<16x8xf32>
    %46 = vector.extract_strided_slice %6 {offsets = [8, 0], sizes = [8, 32], strides = [1, 1]} : vector<32x32xf32> to vector<8x32xf32>
    %cst_26 = arith.constant dense<0.000000e+00> : vector<16x32xf32>
    %47 = tpu.matmul %45, %46, %cst_26 {dimension_numbers = #tpu.dot_dimension_numbers<[1], [0], [0], [1], [0, 0, 1, 1], [], []>} : vector<16x8xf32>, vector<8x32xf32>, vector<16x32xf32> -> vector<16x32xf32>
    %48 = vector.shape_cast %47 : vector<16x32xf32> to vector<2x8x32xf32>
    "tpu.trace_start"() <{level = 10 : i32, message = "nqk,nke->nqe"}> : () -> ()
    %cst_27 = arith.constant dense<0.000000e+00> : vector<2x8x32xf32>
    %49 = tpu.matmul %44, %48, %cst_27 {dimension_numbers = #tpu.dot_dimension_numbers<[2], [1], [1], [2], [0, 0, 0, 1, 1, 2], [0], [0]>} : vector<2x8x8xf32>, vector<2x8x32xf32>, vector<2x8x32xf32> -> vector<2x8x32xf32>
    "tpu.trace_stop"() : () -> ()
    %50 = arith.addf %31, %49 : vector<2x8x32xf32>
    %51 = vector.extract_strided_slice %9 {offsets = [0, 0, 16], sizes = [2, 8, 8], strides = [1, 1, 1]} : vector<2x8x32xf32> to vector<2x8x8xf32>
    %52 = vector.extract_strided_slice %11 {offsets = [0, 0, 16], sizes = [2, 8, 8], strides = [1, 1, 1]} : vector<2x8x32xf32> to vector<2x8x8xf32>
    "tpu.trace_start"() <{level = 10 : i32, message = "nqd,nkd->nqk"}> : () -> ()
    %cst_28 = arith.constant dense<0.000000e+00> : vector<2x8x8xf32>
    %53 = tpu.matmul %51, %52, %cst_28 {dimension_numbers = #tpu.dot_dimension_numbers<[2], [2], [1], [1], [0, 0, 0, 1, 1, 1], [0], [0]>} : vector<2x8x8xf32>, vector<2x8x8xf32>, vector<2x8x8xf32> -> vector<2x8x8xf32>
    "tpu.trace_stop"() : () -> ()
    %54 = arith.addf %53, %3 : vector<2x8x8xf32>
    %cst_29 = arith.constant dense<0xFF800000> : vector<2x8xf32>
    %55 = vector.multi_reduction <maximumf>, %54, %cst_29 [2] : vector<2x8x8xf32> to vector<2x8xf32>
    %56 = vector.shape_cast %55 : vector<2x8xf32> to vector<2x8x1xf32>
    %57 = vector.broadcast %56 : vector<2x8x1xf32> to vector<2x8x8xf32>
    %58 = arith.subf %54, %57 : vector<2x8x8xf32>
    %59 = math.exp %58 : vector<2x8x8xf32>
    %cst_30 = arith.constant dense<0.000000e+00> : vector<2x8xf32>
    %60 = vector.multi_reduction <add>, %59, %cst_30 [2] : vector<2x8x8xf32> to vector<2x8xf32>
    %61 = vector.shape_cast %60 : vector<2x8xf32> to vector<2x8x1xf32>
    %62 = vector.broadcast %61 : vector<2x8x1xf32> to vector<2x8x8xf32>
    %63 = arith.divf %59, %62 : vector<2x8x8xf32>
    %64 = vector.extract_strided_slice %0 {offsets = [0, 16], sizes = [16, 8], strides = [1, 1]} : vector<16x32xf32> to vector<16x8xf32>
    %65 = vector.extract_strided_slice %6 {offsets = [16, 0], sizes = [8, 32], strides = [1, 1]} : vector<32x32xf32> to vector<8x32xf32>
    %cst_31 = arith.constant dense<0.000000e+00> : vector<16x32xf32>
    %66 = tpu.matmul %64, %65, %cst_31 {dimension_numbers = #tpu.dot_dimension_numbers<[1], [0], [0], [1], [0, 0, 1, 1], [], []>} : vector<16x8xf32>, vector<8x32xf32>, vector<16x32xf32> -> vector<16x32xf32>
    %67 = vector.shape_cast %66 : vector<16x32xf32> to vector<2x8x32xf32>
    "tpu.trace_start"() <{level = 10 : i32, message = "nqk,nke->nqe"}> : () -> ()
    %cst_32 = arith.constant dense<0.000000e+00> : vector<2x8x32xf32>
    %68 = tpu.matmul %63, %67, %cst_32 {dimension_numbers = #tpu.dot_dimension_numbers<[2], [1], [1], [2], [0, 0, 0, 1, 1, 2], [0], [0]>} : vector<2x8x8xf32>, vector<2x8x32xf32>, vector<2x8x32xf32> -> vector<2x8x32xf32>
    "tpu.trace_stop"() : () -> ()
    %69 = arith.addf %50, %68 : vector<2x8x32xf32>
    %70 = vector.extract_strided_slice %9 {offsets = [0, 0, 24], sizes = [2, 8, 8], strides = [1, 1, 1]} : vector<2x8x32xf32> to vector<2x8x8xf32>
    %71 = vector.extract_strided_slice %11 {offsets = [0, 0, 24], sizes = [2, 8, 8], strides = [1, 1, 1]} : vector<2x8x32xf32> to vector<2x8x8xf32>
    "tpu.trace_start"() <{level = 10 : i32, message = "nqd,nkd->nqk"}> : () -> ()
    %cst_33 = arith.constant dense<0.000000e+00> : vector<2x8x8xf32>
    %72 = tpu.matmul %70, %71, %cst_33 {dimension_numbers = #tpu.dot_dimension_numbers<[2], [2], [1], [1], [0, 0, 0, 1, 1, 1], [0], [0]>} : vector<2x8x8xf32>, vector<2x8x8xf32>, vector<2x8x8xf32> -> vector<2x8x8xf32>
    "tpu.trace_stop"() : () -> ()
    %73 = arith.addf %72, %3 : vector<2x8x8xf32>
    %cst_34 = arith.constant dense<0xFF800000> : vector<2x8xf32>
    %74 = vector.multi_reduction <maximumf>, %73, %cst_34 [2] : vector<2x8x8xf32> to vector<2x8xf32>
    %75 = vector.shape_cast %74 : vector<2x8xf32> to vector<2x8x1xf32>
    %76 = vector.broadcast %75 : vector<2x8x1xf32> to vector<2x8x8xf32>
    %77 = arith.subf %73, %76 : vector<2x8x8xf32>
    %78 = math.exp %77 : vector<2x8x8xf32>
    %cst_35 = arith.constant dense<0.000000e+00> : vector<2x8xf32>
    %79 = vector.multi_reduction <add>, %78, %cst_35 [2] : vector<2x8x8xf32> to vector<2x8xf32>
    %80 = vector.shape_cast %79 : vector<2x8xf32> to vector<2x8x1xf32>
    %81 = vector.broadcast %80 : vector<2x8x1xf32> to vector<2x8x8xf32>
    %82 = arith.divf %78, %81 : vector<2x8x8xf32>
    %83 = vector.extract_strided_slice %0 {offsets = [0, 24], sizes = [16, 8], strides = [1, 1]} : vector<16x32xf32> to vector<16x8xf32>
    %84 = vector.extract_strided_slice %6 {offsets = [24, 0], sizes = [8, 32], strides = [1, 1]} : vector<32x32xf32> to vector<8x32xf32>
    %cst_36 = arith.constant dense<0.000000e+00> : vector<16x32xf32>
    %85 = tpu.matmul %83, %84, %cst_36 {dimension_numbers = #tpu.dot_dimension_numbers<[1], [0], [0], [1], [0, 0, 1, 1], [], []>} : vector<16x8xf32>, vector<8x32xf32>, vector<16x32xf32> -> vector<16x32xf32>
    %86 = vector.shape_cast %85 : vector<16x32xf32> to vector<2x8x32xf32>
    "tpu.trace_start"() <{level = 10 : i32, message = "nqk,nke->nqe"}> : () -> ()
    %cst_37 = arith.constant dense<0.000000e+00> : vector<2x8x32xf32>
    %87 = tpu.matmul %82, %86, %cst_37 {dimension_numbers = #tpu.dot_dimension_numbers<[2], [1], [1], [2], [0, 0, 0, 1, 1, 2], [0], [0]>} : vector<2x8x8xf32>, vector<2x8x32xf32>, vector<2x8x32xf32> -> vector<2x8x32xf32>
    "tpu.trace_stop"() : () -> ()
    %88 = arith.addf %69, %87 : vector<2x8x32xf32>
    %89 = vector.shape_cast %88 : vector<2x8x32xf32> to vector<16x32xf32>
    %90 = vector.broadcast %7 : vector<1x32xf32> to vector<16x32xf32>
    %91 = arith.addf %89, %90 : vector<16x32xf32>
    %92 = arith.addf %91, %0 : vector<16x32xf32>
    %c0_38 = arith.constant 0 : index
    %c0_39 = arith.constant 0 : index
    %93 = vector.load %arg9[%c0_38, %c0_39] : memref<1x32xf32, #tpu.memory_space<vmem>>, vector<1x32xf32>
    %c0_40 = arith.constant 0 : index
    %c0_41 = arith.constant 0 : index
    %94 = vector.load %arg10[%c0_40, %c0_41] : memref<1x32xf32, #tpu.memory_space<vmem>>, vector<1x32xf32>
    %cst_42 = arith.constant dense<0.000000e+00> : vector<16xf32>
    %95 = vector.multi_reduction <add>, %92, %cst_42 [1] : vector<16x32xf32> to vector<16xf32>
    %96 = vector.shape_cast %95 : vector<16xf32> to vector<16x1xf32>
    %cst_43 = arith.constant 3.200000e+01 : f32
    %97 = vector.broadcast %cst_43 : f32 to vector<16x1xf32>
    %98 = arith.divf %96, %97 : vector<16x1xf32>
    %99 = vector.broadcast %98 : vector<16x1xf32> to vector<16x32xf32>
    %100 = arith.subf %92, %99 : vector<16x32xf32>
    %101 = arith.mulf %100, %100 : vector<16x32xf32>
    %cst_44 = arith.constant dense<0.000000e+00> : vector<16xf32>
    %102 = vector.multi_reduction <add>, %101, %cst_44 [1] : vector<16x32xf32> to vector<16xf32>
    %103 = vector.shape_cast %102 : vector<16xf32> to vector<16x1xf32>
    %cst_45 = arith.constant 3.200000e+01 : f32
    %104 = vector.broadcast %cst_45 : f32 to vector<16x1xf32>
    %105 = arith.divf %103, %104 : vector<16x1xf32>
    %106 = vector.broadcast %98 : vector<16x1xf32> to vector<16x32xf32>
    %107 = arith.subf %92, %106 : vector<16x32xf32>
    %cst_46 = arith.constant 9.99999974E-6 : f32
    %108 = vector.broadcast %cst_46 : f32 to vector<16x1xf32>
    %109 = arith.addf %105, %108 : vector<16x1xf32>
    %110 = math.rsqrt %109 : vector<16x1xf32>
    %111 = vector.broadcast %110 : vector<16x1xf32> to vector<16x32xf32>
    %112 = arith.mulf %107, %111 : vector<16x32xf32>
    %113 = vector.broadcast %93 : vector<1x32xf32> to vector<16x32xf32>
    %114 = arith.mulf %112, %113 : vector<16x32xf32>
    %115 = vector.broadcast %94 : vector<1x32xf32> to vector<16x32xf32>
    %116 = arith.addf %114, %115 : vector<16x32xf32>
    %c0_47 = arith.constant 0 : index
    %c0_48 = arith.constant 0 : index
    %c0_49 = arith.constant 0 : index
    %117 = vector.load %arg4[%c0_47, %c0_48, %c0_49] : memref<2x1x8xf32, #tpu.memory_space<vmem>>, vector<2x1x8xf32>
    %c0_50 = arith.constant 0 : index
    %c0_51 = arith.constant 0 : index
    %118 = vector.load %arg11[%c0_50, %c0_51] : memref<32x32xf32, #tpu.memory_space<vmem>>, vector<32x32xf32>
    %c0_52 = arith.constant 0 : index
    %c0_53 = arith.constant 0 : index
    %119 = vector.load %arg12[%c0_52, %c0_53] : memref<32x32xf32, #tpu.memory_space<vmem>>, vector<32x32xf32>
    %c0_54 = arith.constant 0 : index
    %c0_55 = arith.constant 0 : index
    %120 = vector.load %arg13[%c0_54, %c0_55] : memref<32x32xf32, #tpu.memory_space<vmem>>, vector<32x32xf32>
    %c0_56 = arith.constant 0 : index
    %c0_57 = arith.constant 0 : index
    %121 = vector.load %arg14[%c0_56, %c0_57] : memref<1x32xf32, #tpu.memory_space<vmem>>, vector<1x32xf32>
    %cst_58 = arith.constant dense<0.000000e+00> : vector<16x32xf32>
    %122 = tpu.matmul %116, %118, %cst_58 {dimension_numbers = #tpu.dot_dimension_numbers<[1], [0], [0], [1], [0, 0, 1, 1], [], []>} : vector<16x32xf32>, vector<32x32xf32>, vector<16x32xf32> -> vector<16x32xf32>
    %123 = vector.shape_cast %122 : vector<16x32xf32> to vector<2x8x32xf32>
    %cst_59 = arith.constant dense<0.000000e+00> : vector<16x32xf32>
    %124 = tpu.matmul %2, %119, %cst_59 {dimension_numbers = #tpu.dot_dimension_numbers<[1], [0], [0], [1], [0, 0, 1, 1], [], []>} : vector<16x32xf32>, vector<32x32xf32>, vector<16x32xf32> -> vector<16x32xf32>
    %125 = vector.shape_cast %124 : vector<16x32xf32> to vector<2x8x32xf32>
    %cst_60 = arith.constant 0.000000e+00 : f32
    %126 = vector.broadcast %cst_60 : f32 to vector<2x8x32xf32>
    %127 = vector.extract_strided_slice %123 {offsets = [0, 0, 0], sizes = [2, 8, 8], strides = [1, 1, 1]} : vector<2x8x32xf32> to vector<2x8x8xf32>
    %128 = vector.extract_strided_slice %125 {offsets = [0, 0, 0], sizes = [2, 8, 8], strides = [1, 1, 1]} : vector<2x8x32xf32> to vector<2x8x8xf32>
    "tpu.trace_start"() <{level = 10 : i32, message = "nqd,nkd->nqk"}> : () -> ()
    %cst_61 = arith.constant dense<0.000000e+00> : vector<2x8x8xf32>
    %129 = tpu.matmul %127, %128, %cst_61 {dimension_numbers = #tpu.dot_dimension_numbers<[2], [2], [1], [1], [0, 0, 0, 1, 1, 1], [0], [0]>} : vector<2x8x8xf32>, vector<2x8x8xf32>, vector<2x8x8xf32> -> vector<2x8x8xf32>
    "tpu.trace_stop"() : () -> ()
    %130 = vector.broadcast %117 : vector<2x1x8xf32> to vector<2x8x8xf32>
    %131 = arith.addf %129, %130 : vector<2x8x8xf32>
    %cst_62 = arith.constant dense<0xFF800000> : vector<2x8xf32>
    %132 = vector.multi_reduction <maximumf>, %131, %cst_62 [2] : vector<2x8x8xf32> to vector<2x8xf32>
    %133 = vector.shape_cast %132 : vector<2x8xf32> to vector<2x8x1xf32>
    %134 = vector.broadcast %133 : vector<2x8x1xf32> to vector<2x8x8xf32>
    %135 = arith.subf %131, %134 : vector<2x8x8xf32>
    %136 = math.exp %135 : vector<2x8x8xf32>
    %cst_63 = arith.constant dense<0.000000e+00> : vector<2x8xf32>
    %137 = vector.multi_reduction <add>, %136, %cst_63 [2] : vector<2x8x8xf32> to vector<2x8xf32>
    %138 = vector.shape_cast %137 : vector<2x8xf32> to vector<2x8x1xf32>
    %139 = vector.broadcast %138 : vector<2x8x1xf32> to vector<2x8x8xf32>
    %140 = arith.divf %136, %139 : vector<2x8x8xf32>
    %141 = vector.extract_strided_slice %1 {offsets = [0, 0], sizes = [16, 8], strides = [1, 1]} : vector<16x32xf32> to vector<16x8xf32>
    %142 = vector.extract_strided_slice %120 {offsets = [0, 0], sizes = [8, 32], strides = [1, 1]} : vector<32x32xf32> to vector<8x32xf32>
    %cst_64 = arith.constant dense<0.000000e+00> : vector<16x32xf32>
    %143 = tpu.matmul %141, %142, %cst_64 {dimension_numbers = #tpu.dot_dimension_numbers<[1], [0], [0], [1], [0, 0, 1, 1], [], []>} : vector<16x8xf32>, vector<8x32xf32>, vector<16x32xf32> -> vector<16x32xf32>
    %144 = vector.shape_cast %143 : vector<16x32xf32> to vector<2x8x32xf32>
    "tpu.trace_start"() <{level = 10 : i32, message = "nqk,nke->nqe"}> : () -> ()
    %cst_65 = arith.constant dense<0.000000e+00> : vector<2x8x32xf32>
    %145 = tpu.matmul %140, %144, %cst_65 {dimension_numbers = #tpu.dot_dimension_numbers<[2], [1], [1], [2], [0, 0, 0, 1, 1, 2], [0], [0]>} : vector<2x8x8xf32>, vector<2x8x32xf32>, vector<2x8x32xf32> -> vector<2x8x32xf32>
    "tpu.trace_stop"() : () -> ()
    %146 = arith.addf %126, %145 : vector<2x8x32xf32>
    %147 = vector.extract_strided_slice %123 {offsets = [0, 0, 8], sizes = [2, 8, 8], strides = [1, 1, 1]} : vector<2x8x32xf32> to vector<2x8x8xf32>
    %148 = vector.extract_strided_slice %125 {offsets = [0, 0, 8], sizes = [2, 8, 8], strides = [1, 1, 1]} : vector<2x8x32xf32> to vector<2x8x8xf32>
    "tpu.trace_start"() <{level = 10 : i32, message = "nqd,nkd->nqk"}> : () -> ()
    %cst_66 = arith.constant dense<0.000000e+00> : vector<2x8x8xf32>
    %149 = tpu.matmul %147, %148, %cst_66 {dimension_numbers = #tpu.dot_dimension_numbers<[2], [2], [1], [1], [0, 0, 0, 1, 1, 1], [0], [0]>} : vector<2x8x8xf32>, vector<2x8x8xf32>, vector<2x8x8xf32> -> vector<2x8x8xf32>
    "tpu.trace_stop"() : () -> ()
    %150 = vector.broadcast %117 : vector<2x1x8xf32> to vector<2x8x8xf32>
    %151 = arith.addf %149, %150 : vector<2x8x8xf32>
    %cst_67 = arith.constant dense<0xFF800000> : vector<2x8xf32>
    %152 = vector.multi_reduction <maximumf>, %151, %cst_67 [2] : vector<2x8x8xf32> to vector<2x8xf32>
    %153 = vector.shape_cast %152 : vector<2x8xf32> to vector<2x8x1xf32>
    %154 = vector.broadcast %153 : vector<2x8x1xf32> to vector<2x8x8xf32>
    %155 = arith.subf %151, %154 : vector<2x8x8xf32>
    %156 = math.exp %155 : vector<2x8x8xf32>
    %cst_68 = arith.constant dense<0.000000e+00> : vector<2x8xf32>
    %157 = vector.multi_reduction <add>, %156, %cst_68 [2] : vector<2x8x8xf32> to vector<2x8xf32>
    %158 = vector.shape_cast %157 : vector<2x8xf32> to vector<2x8x1xf32>
    %159 = vector.broadcast %158 : vector<2x8x1xf32> to vector<2x8x8xf32>
    %160 = arith.divf %156, %159 : vector<2x8x8xf32>
    %161 = vector.extract_strided_slice %1 {offsets = [0, 8], sizes = [16, 8], strides = [1, 1]} : vector<16x32xf32> to vector<16x8xf32>
    %162 = vector.extract_strided_slice %120 {offsets = [8, 0], sizes = [8, 32], strides = [1, 1]} : vector<32x32xf32> to vector<8x32xf32>
    %cst_69 = arith.constant dense<0.000000e+00> : vector<16x32xf32>
    %163 = tpu.matmul %161, %162, %cst_69 {dimension_numbers = #tpu.dot_dimension_numbers<[1], [0], [0], [1], [0, 0, 1, 1], [], []>} : vector<16x8xf32>, vector<8x32xf32>, vector<16x32xf32> -> vector<16x32xf32>
    %164 = vector.shape_cast %163 : vector<16x32xf32> to vector<2x8x32xf32>
    "tpu.trace_start"() <{level = 10 : i32, message = "nqk,nke->nqe"}> : () -> ()
    %cst_70 = arith.constant dense<0.000000e+00> : vector<2x8x32xf32>
    %165 = tpu.matmul %160, %164, %cst_70 {dimension_numbers = #tpu.dot_dimension_numbers<[2], [1], [1], [2], [0, 0, 0, 1, 1, 2], [0], [0]>} : vector<2x8x8xf32>, vector<2x8x32xf32>, vector<2x8x32xf32> -> vector<2x8x32xf32>
    "tpu.trace_stop"() : () -> ()
    %166 = arith.addf %146, %165 : vector<2x8x32xf32>
    %167 = vector.extract_strided_slice %123 {offsets = [0, 0, 16], sizes = [2, 8, 8], strides = [1, 1, 1]} : vector<2x8x32xf32> to vector<2x8x8xf32>
    %168 = vector.extract_strided_slice %125 {offsets = [0, 0, 16], sizes = [2, 8, 8], strides = [1, 1, 1]} : vector<2x8x32xf32> to vector<2x8x8xf32>
    "tpu.trace_start"() <{level = 10 : i32, message = "nqd,nkd->nqk"}> : () -> ()
    %cst_71 = arith.constant dense<0.000000e+00> : vector<2x8x8xf32>
    %169 = tpu.matmul %167, %168, %cst_71 {dimension_numbers = #tpu.dot_dimension_numbers<[2], [2], [1], [1], [0, 0, 0, 1, 1, 1], [0], [0]>} : vector<2x8x8xf32>, vector<2x8x8xf32>, vector<2x8x8xf32> -> vector<2x8x8xf32>
    "tpu.trace_stop"() : () -> ()
    %170 = vector.broadcast %117 : vector<2x1x8xf32> to vector<2x8x8xf32>
    %171 = arith.addf %169, %170 : vector<2x8x8xf32>
    %cst_72 = arith.constant dense<0xFF800000> : vector<2x8xf32>
    %172 = vector.multi_reduction <maximumf>, %171, %cst_72 [2] : vector<2x8x8xf32> to vector<2x8xf32>
    %173 = vector.shape_cast %172 : vector<2x8xf32> to vector<2x8x1xf32>
    %174 = vector.broadcast %173 : vector<2x8x1xf32> to vector<2x8x8xf32>
    %175 = arith.subf %171, %174 : vector<2x8x8xf32>
    %176 = math.exp %175 : vector<2x8x8xf32>
    %cst_73 = arith.constant dense<0.000000e+00> : vector<2x8xf32>
    %177 = vector.multi_reduction <add>, %176, %cst_73 [2] : vector<2x8x8xf32> to vector<2x8xf32>
    %178 = vector.shape_cast %177 : vector<2x8xf32> to vector<2x8x1xf32>
    %179 = vector.broadcast %178 : vector<2x8x1xf32> to vector<2x8x8xf32>
    %180 = arith.divf %176, %179 : vector<2x8x8xf32>
    %181 = vector.extract_strided_slice %1 {offsets = [0, 16], sizes = [16, 8], strides = [1, 1]} : vector<16x32xf32> to vector<16x8xf32>
    %182 = vector.extract_strided_slice %120 {offsets = [16, 0], sizes = [8, 32], strides = [1, 1]} : vector<32x32xf32> to vector<8x32xf32>
    %cst_74 = arith.constant dense<0.000000e+00> : vector<16x32xf32>
    %183 = tpu.matmul %181, %182, %cst_74 {dimension_numbers = #tpu.dot_dimension_numbers<[1], [0], [0], [1], [0, 0, 1, 1], [], []>} : vector<16x8xf32>, vector<8x32xf32>, vector<16x32xf32> -> vector<16x32xf32>
    %184 = vector.shape_cast %183 : vector<16x32xf32> to vector<2x8x32xf32>
    "tpu.trace_start"() <{level = 10 : i32, message = "nqk,nke->nqe"}> : () -> ()
    %cst_75 = arith.constant dense<0.000000e+00> : vector<2x8x32xf32>
    %185 = tpu.matmul %180, %184, %cst_75 {dimension_numbers = #tpu.dot_dimension_numbers<[2], [1], [1], [2], [0, 0, 0, 1, 1, 2], [0], [0]>} : vector<2x8x8xf32>, vector<2x8x32xf32>, vector<2x8x32xf32> -> vector<2x8x32xf32>
    "tpu.trace_stop"() : () -> ()
    %186 = arith.addf %166, %185 : vector<2x8x32xf32>
    %187 = vector.extract_strided_slice %123 {offsets = [0, 0, 24], sizes = [2, 8, 8], strides = [1, 1, 1]} : vector<2x8x32xf32> to vector<2x8x8xf32>
    %188 = vector.extract_strided_slice %125 {offsets = [0, 0, 24], sizes = [2, 8, 8], strides = [1, 1, 1]} : vector<2x8x32xf32> to vector<2x8x8xf32>
    "tpu.trace_start"() <{level = 10 : i32, message = "nqd,nkd->nqk"}> : () -> ()
    %cst_76 = arith.constant dense<0.000000e+00> : vector<2x8x8xf32>
    %189 = tpu.matmul %187, %188, %cst_76 {dimension_numbers = #tpu.dot_dimension_numbers<[2], [2], [1], [1], [0, 0, 0, 1, 1, 1], [0], [0]>} : vector<2x8x8xf32>, vector<2x8x8xf32>, vector<2x8x8xf32> -> vector<2x8x8xf32>
    "tpu.trace_stop"() : () -> ()
    %190 = vector.broadcast %117 : vector<2x1x8xf32> to vector<2x8x8xf32>
    %191 = arith.addf %189, %190 : vector<2x8x8xf32>
    %cst_77 = arith.constant dense<0xFF800000> : vector<2x8xf32>
    %192 = vector.multi_reduction <maximumf>, %191, %cst_77 [2] : vector<2x8x8xf32> to vector<2x8xf32>
    %193 = vector.shape_cast %192 : vector<2x8xf32> to vector<2x8x1xf32>
    %194 = vector.broadcast %193 : vector<2x8x1xf32> to vector<2x8x8xf32>
    %195 = arith.subf %191, %194 : vector<2x8x8xf32>
    %196 = math.exp %195 : vector<2x8x8xf32>
    %cst_78 = arith.constant dense<0.000000e+00> : vector<2x8xf32>
    %197 = vector.multi_reduction <add>, %196, %cst_78 [2] : vector<2x8x8xf32> to vector<2x8xf32>
    %198 = vector.shape_cast %197 : vector<2x8xf32> to vector<2x8x1xf32>
    %199 = vector.broadcast %198 : vector<2x8x1xf32> to vector<2x8x8xf32>
    %200 = arith.divf %196, %199 : vector<2x8x8xf32>
    %201 = vector.extract_strided_slice %1 {offsets = [0, 24], sizes = [16, 8], strides = [1, 1]} : vector<16x32xf32> to vector<16x8xf32>
    %202 = vector.extract_strided_slice %120 {offsets = [24, 0], sizes = [8, 32], strides = [1, 1]} : vector<32x32xf32> to vector<8x32xf32>
    %cst_79 = arith.constant dense<0.000000e+00> : vector<16x32xf32>
    %203 = tpu.matmul %201, %202, %cst_79 {dimension_numbers = #tpu.dot_dimension_numbers<[1], [0], [0], [1], [0, 0, 1, 1], [], []>} : vector<16x8xf32>, vector<8x32xf32>, vector<16x32xf32> -> vector<16x32xf32>
    %204 = vector.shape_cast %203 : vector<16x32xf32> to vector<2x8x32xf32>
    "tpu.trace_start"() <{level = 10 : i32, message = "nqk,nke->nqe"}> : () -> ()
    %cst_80 = arith.constant dense<0.000000e+00> : vector<2x8x32xf32>
    %205 = tpu.matmul %200, %204, %cst_80 {dimension_numbers = #tpu.dot_dimension_numbers<[2], [1], [1], [2], [0, 0, 0, 1, 1, 2], [0], [0]>} : vector<2x8x8xf32>, vector<2x8x32xf32>, vector<2x8x32xf32> -> vector<2x8x32xf32>
    "tpu.trace_stop"() : () -> ()
    %206 = arith.addf %186, %205 : vector<2x8x32xf32>
    %207 = vector.shape_cast %206 : vector<2x8x32xf32> to vector<16x32xf32>
    %208 = vector.broadcast %121 : vector<1x32xf32> to vector<16x32xf32>
    %209 = arith.addf %207, %208 : vector<16x32xf32>
    %210 = arith.addf %209, %116 : vector<16x32xf32>
    %c0_81 = arith.constant 0 : index
    %c0_82 = arith.constant 0 : index
    %211 = vector.load %arg15[%c0_81, %c0_82] : memref<1x32xf32, #tpu.memory_space<vmem>>, vector<1x32xf32>
    %c0_83 = arith.constant 0 : index
    %c0_84 = arith.constant 0 : index
    %212 = vector.load %arg16[%c0_83, %c0_84] : memref<1x32xf32, #tpu.memory_space<vmem>>, vector<1x32xf32>
    %cst_85 = arith.constant dense<0.000000e+00> : vector<16xf32>
    %213 = vector.multi_reduction <add>, %210, %cst_85 [1] : vector<16x32xf32> to vector<16xf32>
    %214 = vector.shape_cast %213 : vector<16xf32> to vector<16x1xf32>
    %cst_86 = arith.constant 3.200000e+01 : f32
    %215 = vector.broadcast %cst_86 : f32 to vector<16x1xf32>
    %216 = arith.divf %214, %215 : vector<16x1xf32>
    %217 = vector.broadcast %216 : vector<16x1xf32> to vector<16x32xf32>
    %218 = arith.subf %210, %217 : vector<16x32xf32>
    %219 = arith.mulf %218, %218 : vector<16x32xf32>
    %cst_87 = arith.constant dense<0.000000e+00> : vector<16xf32>
    %220 = vector.multi_reduction <add>, %219, %cst_87 [1] : vector<16x32xf32> to vector<16xf32>
    %221 = vector.shape_cast %220 : vector<16xf32> to vector<16x1xf32>
    %cst_88 = arith.constant 3.200000e+01 : f32
    %222 = vector.broadcast %cst_88 : f32 to vector<16x1xf32>
    %223 = arith.divf %221, %222 : vector<16x1xf32>
    %224 = vector.broadcast %216 : vector<16x1xf32> to vector<16x32xf32>
    %225 = arith.subf %210, %224 : vector<16x32xf32>
    %cst_89 = arith.constant 9.99999974E-6 : f32
    %226 = vector.broadcast %cst_89 : f32 to vector<16x1xf32>
    %227 = arith.addf %223, %226 : vector<16x1xf32>
    %228 = math.rsqrt %227 : vector<16x1xf32>
    %229 = vector.broadcast %228 : vector<16x1xf32> to vector<16x32xf32>
    %230 = arith.mulf %225, %229 : vector<16x32xf32>
    %231 = vector.broadcast %211 : vector<1x32xf32> to vector<16x32xf32>
    %232 = arith.mulf %230, %231 : vector<16x32xf32>
    %233 = vector.broadcast %212 : vector<1x32xf32> to vector<16x32xf32>
    %234 = arith.addf %232, %233 : vector<16x32xf32>
    %c0_90 = arith.constant 0 : index
    %c0_91 = arith.constant 0 : index
    %235 = vector.load %arg17[%c0_90, %c0_91] : memref<32x128xf32, #tpu.memory_space<vmem>>, vector<32x128xf32>
    %cst_92 = arith.constant dense<0.000000e+00> : vector<16x128xf32>
    %236 = tpu.matmul %234, %235, %cst_92 {dimension_numbers = #tpu.dot_dimension_numbers<[1], [0], [0], [1], [0, 0, 1, 1], [], []>} : vector<16x32xf32>, vector<32x128xf32>, vector<16x128xf32> -> vector<16x128xf32>
    %c0_93 = arith.constant 0 : index
    %c0_94 = arith.constant 0 : index
    %237 = vector.load %arg18[%c0_93, %c0_94] : memref<1x128xf32, #tpu.memory_space<vmem>>, vector<1x128xf32>
    %238 = vector.broadcast %237 : vector<1x128xf32> to vector<16x128xf32>
    %239 = arith.addf %236, %238 : vector<16x128xf32>
    %cst_95 = arith.constant 0.000000e+00 : f32
    %240 = vector.broadcast %cst_95 : f32 to vector<16x128xf32>
    %241 = arith.maximumf %239, %240 : vector<16x128xf32>
    %c0_96 = arith.constant 0 : index
    %c0_97 = arith.constant 0 : index
    %242 = vector.load %arg19[%c0_96, %c0_97] : memref<128x32xf32, #tpu.memory_space<vmem>>, vector<128x32xf32>
    %cst_98 = arith.constant dense<0.000000e+00> : vector<16x32xf32>
    %243 = tpu.matmul %241, %242, %cst_98 {dimension_numbers = #tpu.dot_dimension_numbers<[1], [0], [0], [1], [0, 0, 1, 1], [], []>} : vector<16x128xf32>, vector<128x32xf32>, vector<16x32xf32> -> vector<16x32xf32>
    %c0_99 = arith.constant 0 : index
    %c0_100 = arith.constant 0 : index
    %244 = vector.load %arg20[%c0_99, %c0_100] : memref<1x32xf32, #tpu.memory_space<vmem>>, vector<1x32xf32>
    %245 = vector.broadcast %244 : vector<1x32xf32> to vector<16x32xf32>
    %246 = arith.addf %243, %245 : vector<16x32xf32>
    %247 = arith.addf %246, %234 : vector<16x32xf32>
    %c0_101 = arith.constant 0 : index
    %c0_102 = arith.constant 0 : index
    %248 = vector.load %arg21[%c0_101, %c0_102] : memref<1x32xf32, #tpu.memory_space<vmem>>, vector<1x32xf32>
    %c0_103 = arith.constant 0 : index
    %c0_104 = arith.constant 0 : index
    %249 = vector.load %arg22[%c0_103, %c0_104] : memref<1x32xf32, #tpu.memory_space<vmem>>, vector<1x32xf32>
    %cst_105 = arith.constant dense<0.000000e+00> : vector<16xf32>
    %250 = vector.multi_reduction <add>, %247, %cst_105 [1] : vector<16x32xf32> to vector<16xf32>
    %251 = vector.shape_cast %250 : vector<16xf32> to vector<16x1xf32>
    %cst_106 = arith.constant 3.200000e+01 : f32
    %252 = vector.broadcast %cst_106 : f32 to vector<16x1xf32>
    %253 = arith.divf %251, %252 : vector<16x1xf32>
    %254 = vector.broadcast %253 : vector<16x1xf32> to vector<16x32xf32>
    %255 = arith.subf %247, %254 : vector<16x32xf32>
    %256 = arith.mulf %255, %255 : vector<16x32xf32>
    %cst_107 = arith.constant dense<0.000000e+00> : vector<16xf32>
    %257 = vector.multi_reduction <add>, %256, %cst_107 [1] : vector<16x32xf32> to vector<16xf32>
    %258 = vector.shape_cast %257 : vector<16xf32> to vector<16x1xf32>
    %cst_108 = arith.constant 3.200000e+01 : f32
    %259 = vector.broadcast %cst_108 : f32 to vector<16x1xf32>
    %260 = arith.divf %258, %259 : vector<16x1xf32>
    %261 = vector.broadcast %253 : vector<16x1xf32> to vector<16x32xf32>
    %262 = arith.subf %247, %261 : vector<16x32xf32>
    %cst_109 = arith.constant 9.99999974E-6 : f32
    %263 = vector.broadcast %cst_109 : f32 to vector<16x1xf32>
    %264 = arith.addf %260, %263 : vector<16x1xf32>
    %265 = math.rsqrt %264 : vector<16x1xf32>
    %266 = vector.broadcast %265 : vector<16x1xf32> to vector<16x32xf32>
    %267 = arith.mulf %262, %266 : vector<16x32xf32>
    %268 = vector.broadcast %248 : vector<1x32xf32> to vector<16x32xf32>
    %269 = arith.mulf %267, %268 : vector<16x32xf32>
    %270 = vector.broadcast %249 : vector<1x32xf32> to vector<16x32xf32>
    %271 = arith.addf %269, %270 : vector<16x32xf32>
    %c0_110 = arith.constant 0 : index
    %c0_111 = arith.constant 0 : index
    %272 = vector.load %arg23[%c0_110, %c0_111] : memref<16x32xf32, #tpu.memory_space<vmem>>, vector<16x32xf32>
    tpu.vector_store %arg23[%c0_110, %c0_111], %271 {strides = array<i32>} : memref<16x32xf32, #tpu.memory_space<vmem>>, vector<16x32xf32>,
    return
  }
}

</mosaic_0001>

<bundles_post_ra>
// kernel: decoder_block_forward.1
= control target key start
LH: loop header
LB: loop body
LE: loop exit
PB: predicated region body
PF: predicated region fallthrough
CT: control target
= control target key end

     0   :  { %s5478_s0 = inlined_call_operand.vmem [shape: f32[16,32], index: 0, kind: input, shape index: {}]   ;;  %s5479_s1 = inlined_call_operand.vmem [shape: f32[16,32], index: 1, kind: input, shape index: {}]   ;;  %s5480_s2 = inlined_call_operand.vmem [shape: f32[16,32], index: 2, kind: input, shape index: {}]   ;;  %s5481_s3 = inlined_call_operand.vmem [shape: f32[2,8,8], index: 3, kind: input, shape index: {}]   ;;  %s5482_s4 = inlined_call_operand.vmem [shape: f32[2,1,8], index: 4, kind: input, shape index: {}]   ;;  %s5483_s5 = inlined_call_operand.vmem [shape: f32[32,32], index: 5, kind: input, shape index: {}]   ;;  %s5484_s6 = inlined_call_operand.vmem [shape: f32[32,32], index: 6, kind: input, shape index: {}]   ;;  %s5485_s7 = inlined_call_operand.vmem [shape: f32[32,32], index: 7, kind: input, shape index: {}]   ;;  %s5486_s8 = inlined_call_operand.vmem [shape: f32[1,32], index: 8, kind: input, shape index: {}]   ;;  %s5487_s9 = inlined_call_operand.vmem [shape: f32[1,32], index: 9, kind: input, shape index: {}]   ;;  %s5488_s10 = inlined_call_operand.vmem [shape: f32[1,32], index: 10, kind: input, shape index: {}]   ;;  %s5489_s11 = inlined_call_operand.vmem [shape: f32[32,32], index: 11, kind: input, shape index: {}]   ;;  %s5490_s12 = inlined_call_operand.vmem [shape: f32[32,32], index: 12, kind: input, shape index: {}]   ;;  %s5491_s13 = inlined_call_operand.vmem [shape: f32[32,32], index: 13, kind: input, shape index: {}]   ;;  %s5492_s14 = inlined_call_operand.vmem [shape: f32[1,32], index: 14, kind: input, shape index: {}]   ;;  %s5493_s15 = inlined_call_operand.vmem [shape: f32[1,32], index: 15, kind: input, shape index: {}]   ;;  %s5494_s16 = inlined_call_operand.vmem [shape: f32[1,32], index: 16, kind: input, shape index: {}]   ;;  %s5495_s17 = inlined_call_operand.vmem [shape: f32[32,128], index: 17, kind: input, shape index: {}]   ;;  %s5496_s18 = inlined_call_operand.vmem [shape: f32[1,128], index: 18, kind: input, shape index: {}]   ;;  %s5497_s19 = inlined_call_operand.vmem [shape: f32[128,32], index: 19, kind: input, shape index: {}]   ;;  %s5498_s20 = inlined_call_operand.vmem [shape: f32[1,32], index: 20, kind: input, shape index: {}]   ;;  %s5499_s21 = inlined_call_operand.vmem [shape: f32[1,32], index: 21, kind: input, shape index: {}]   ;;  %s5500_s22 = inlined_call_operand.vmem [shape: f32[1,32], index: 22, kind: input, shape index: {}]   ;;  %s5501_s23 = inlined_call_operand.hbm [shape: f32[16,32], index: 23, kind: output, shape index: {}]  }
   0x1   :  { %5510 = sst [smem:[#allocation5_spill]] %s5478_s0 }
   0x2   :  { %5511 = sst [smem:[#allocation6_spill]] %s5479_s1 }
   0x3   :  { %5512 = sst [smem:[#allocation7_spill]] %s5480_s2 }
   0x4   :  { %5513 = sst [smem:[#allocation8_spill]] %s5481_s3 }
   0x5   :  { %5514 = sst [smem:[#allocation9_spill]] %s5482_s4 }
   0x6   :  { %5515 = sst [smem:[#allocation10_spill]] %s5483_s5 }
   0x7   :  { %5516 = sst [smem:[#allocation11_spill]] %s5484_s6 }
   0x8   :  { %5517 = sst [smem:[#allocation12_spill]] %s5485_s7 }
   0x9   :  { %s5518_s24 = sld [smem:[#allocation10_spill]]  ;;  %vm96_vm0 = vcmask 261120   ;;  %s5519_s28 = sld [smem:[#allocation5_spill]] }
   0xa   :  { %s5520_s0 = sld [smem:[#allocation11_spill]] }
   0xf   :  { %v83_v0 = vld [vmem:[%s5518_s24] sm:$0xff]  ;;  %v84_v1 = vld [vmem:[%s5518_s24 + $0x8] sm:$0xff]  ;;  %v85_v2 = vld [vmem:[%s5518_s24 + $0x10] sm:$0xff] }
  0x10   :  { %v4570_v3 = vpack.c.bf16 %v84_v1, %v83_v0  ;;  %v86_v4 = vld [vmem:[%s5518_s24 + $0x18] sm:$0xff]  ;;  %v4893_v5 = vld [vmem:[%s5519_s28] sm:$0xff]  ;;  %v88_v8 = vld [vmem:[%s5520_s0 + $0x8] sm:$0xff] }
  0x11   :  { %v4574_v6 = vpack.c.bf16 %v86_v4, %v85_v2  ;;  %4288 = vmatprep.mubr.msk.f32.mxu0 %vm96_vm0, %v4893_v5  ;;  %v87_v7 = vld [vmem:[%s5520_s0] sm:$0xff] }
  0x12   :  { %4571 = vmatprep.subr.bf16.mxu0 %v4570_v3 }
  0x13   :  { %28 = vsyncpa [#allocation3], 0  ;;  %4573 = vmatpush3.bf16.msra.mxu0 %v4570_v3  ;;  %v4578_v9 = vpack.c.bf16 %v88_v8, %v87_v7  ;;  %v89_v10 = vld [vmem:[%s5520_s0 + $0x10] sm:$0xff]  ;;  %v90_v11 = vld [vmem:[%s5520_s0 + $0x18] sm:$0xff]  ;;  %v4750_v14 = vmov 0.0   ;;  %vm4751_vm1 = vmmov 0  }
  0x14   :  { %4575 = vmatprep.subr.bf16.mxu0 %v4574_v6  ;;  %v4912_v12 = vld [vmem:[%s5519_s28 + $0x8] sm:$0xff]  ;;  %v4582_v13 = vpack.c.bf16 %v90_v11, %v89_v10  ;;  %4317 = vmatprep.subr.mxu1 %v4750_v14  ;;  %s4752_s6 = smov 120   ;;  %vm253_vm2 = vcmask 64512   ;;  %s5521_s28 = sld [smem:[#allocation12_spill]] }
  0x15   :  { %4319 = vmatprep.mubr.msk.f32.mxu1 %vm4751_vm1, %v4750_v14  ;;  %s5522_s30 = sld [smem:[#allocation8_spill]]  ;;  %s4753_s5 = smov 112  }
  0x16   :  { %s4754_s2 = smov 104   ;;  %s5523_s3 = sld [smem:[#allocation7_spill]] }
  0x17   :  { %4577 = vmatpush3.bf16.msra.mxu0 %v4574_v6  ;;  %s5524_s29 = sld [smem:[#allocation6_spill]]  ;;  %s4755_s27 = smov [#allocation2]  }
  0x18   :  { %4579 = vmatprep.subr.bf16.mxu0 %v4578_v9 }
  0x1a   :  { %4289 = vmatmul.mubr.msk.f32.vlgmr.msra.gmra.mrb[0].mxu0 %vm96_vm0, %v4912_v12  ;;  %v91_v19 = vld [vmem:[%s5521_s28] sm:$0xff]  ;;  %v92_v25 = vld [vmem:[%s5521_s28 + $0x8] sm:$0xff] }
  0x1b   :  { %4581 = vmatpush3.bf16.msra.mxu0 %v4578_v9  ;;  %4299 = vmatprep.mubr.msk.f32.mxu0 %vm96_vm0, %v4893_v5  ;;  %v4989_v33 = vld [vmem:[%s5522_s30] sm:$0xff]  ;;  %v4997_v39 = vld [vmem:[%s5522_s30 + $0x8] sm:$0xff]  ;;  %s5525_s30 = sld [smem:[#allocation9_spill]] }
  0x1c   :  { %4583 = vmatprep.subr.bf16.mxu0 %v4582_v13 }
  0x1f   :  { %4585 = vmatpush3.bf16.msra.mxu0 %v4582_v13 }
  0x20   :  { %4302 = vmatprep.subr.mxu0 %v4750_v14 }
  0x22   :  { %4300 = vmatmul.mubr.msk.f32.vlgmr.msra.gmra.mrb[2].mxu0 %vm96_vm0, %v4912_v12 }
  0x23   :  { %4304 = vmatprep.mubr.msk.f32.mxu0 %vm4751_vm1, %v4750_v14 }
  0xed   :  { %v4926_v15 = vpop.f32.mrb[0].mxu0 }
  0xee   :  { %v4928_v16 = vpop.f32.mrb[1].mxu0 }
  0xef   :  { %507 = vrot.lane.b32.xlu1 %v4928_v16, %s4752_s6 }
  0xf3   :  { %585 = vrot.lane.b32.xlu1 %v4926_v15, %s4752_s6 }
  0xf5   :  { %v4934_v17 = vpop.f32.mrb[2].mxu0 }
  0xf6   :  { %v4936_v18 = vpop.f32.mrb[3].mxu0 }
  0xf7   :  { %509 = vrot.lane.b32.xlu0 %v4936_v18, %s4752_s6  ;;  %4303 = vmatpush3.xpose.msk.msra.mxu0 %vm253_vm2, %v4936_v18 }
  0xf8   :  { %4307 = vmatprep.subr.mxu0 %v4750_v14  ;;  %687 = vrot.lane.b32.xlu1 %v4912_v12, %s4752_s6 }
  0xfa   :  { %4305 = vmatmul.mubr.msk.f32.vlgmr.msra.gmra.mrb[4].mxu0 %vm253_vm2, %v4928_v16 }
  0xfb   :  { %587 = vrot.lane.b32.xlu0 %v4934_v17, %s4752_s6  ;;  %4308 = vmatpush3.xpose.msk.msra.mxu0 %vm253_vm2, %v4934_v17 }
  0xfc   :  { %4309 = vmatprep.mubr.msk.f32.mxu0 %vm4751_vm1, %v4750_v14  ;;  %4312 = vmatprep.subr.mxu0 %v91_v19 }
  0xfe   :  { %4310 = vmatmul.mubr.msk.f32.vlgmr.msra.gmra.mrb[6].mxu0 %vm253_vm2, %v4926_v15 }
  0xff   :  { %4313 = vmatpush3.msra.mxu0 %v91_v19  ;;  %4314 = vmatprep.mubr.msk.f32.mxu0 %vm253_vm2, %v4893_v5 }
 0x100   :  { %4322 = vmatprep.subr.mxu0 %v4750_v14  ;;  %685 = vrot.lane.b32.xlu0 %v4893_v5, %s4752_s6 }
 0x102   :  { %4315 = vmatmul.mubr.msk.f32.vlgmr.msra.gmra.mrb[8].mxu0 %vm253_vm2, %v4912_v12 }
 0x103   :  { %4324 = vmatprep.mubr.msk.f32.mxu0 %vm4751_vm1, %v4750_v14 }
 0x161   :  { %v508_v21 = vpop.permute.xlu1 %507 }
 0x165   :  { %v586_v23 = vpop.permute.xlu1 %585 }
 0x169   :  { %v510_v20 = vpop.permute.xlu0 %509 }
 0x16a   :  { %4318 = vmatpush3.xpose.msk.msra.mxu1 %vm253_vm2, %v510_v20  ;;  %v688_v26 = vpop.permute.xlu1 %687 }
 0x16b   :  { %4327 = vmatprep.subr.mxu1 %v92_v25 }
 0x16d   :  { %4320 = vmatmul.mubr.msk.f32.vlgmr.msra.gmra.mrb[0].mxu1 %vm253_vm2, %v508_v21  ;;  %v588_v22 = vpop.permute.xlu0 %587 }
 0x16e   :  { %4323 = vmatpush3.xpose.msk.msra.mxu0 %vm253_vm2, %v588_v22  ;;  %4328 = vmatpush3.msra.mxu1 %v92_v25 }
 0x16f   :  { %4332 = vmatprep.subr.mxu0 %v4750_v14  ;;  %4337 = vmatprep.subr.mxu1 %v4750_v14 }
 0x171   :  { %4325 = vmatmul.mubr.msk.f32.vlgmr.msra.gmra.mrb[10].mxu0 %vm253_vm2, %v586_v23 }
 0x172   :  { %4334 = vmatprep.mubr.msk.f32.mxu0 %vm4751_vm1, %v4750_v14  ;;  %v686_v24 = vpop.permute.xlu0 %685 }
 0x173   :  { %4329 = vmatprep.mubr.msk.f32.mxu1 %vm253_vm2, %v686_v24 }
 0x174   :  { %4330 = vmatmul.mubr.msk.f32.vlgmr.msra.gmra.mrb[2].mxu1 %vm253_vm2, %v688_v26 }
 0x175   :  { %4339 = vmatprep.mubr.msk.f32.mxu1 %vm4751_vm1, %v4750_v14 }
 0x1cd   :  { %v326_v27 = vpop.f32.mrb[4].mxu0 }
 0x1ce   :  { %v4306_v28 = vpop.f32.mrb[5].mxu0  ;;  %v327_v37 = vadd.f32 %v326_v27, %v4989_v33 }
 0x1d0   :  { %v406_v44 = vsel %vm253_vm2, %v327_v37, -inf }
 0x1d1   :  { %v402_v29 = vpop.f32.mrb[6].mxu0 }
 0x1d2   :  { %v4311_v30 = vpop.f32.mrb[7].mxu0  ;;  %v403_v43 = vadd.f32 %v402_v29, %v4997_v39  ;;  %v93_v29 = vld [vmem:[%s5521_s28 + $0x10] sm:$0xff] }
 0x1d4   :  { %v409_v46 = vsel %vm253_vm2, %v403_v43, -inf }
 0x1d5   :  { %v4982_v31 = vpop.f32.mrb[8].mxu0 }
 0x1d6   :  { %v4984_v32 = vpop.f32.mrb[9].mxu0 }
 0x240   :  { %v581_v34 = vpop.f32.mrb[0].mxu1 }
 0x241   :  { %v582_v35 = vadd.f32 %v581_v34, %v4989_v33  ;;  %v4321_v36 = vpop.f32.mrb[1].mxu1 }
 0x243   :  { %v663_v38 = vsel %vm253_vm2, %v582_v35, -inf }
 0x244   :  { %664 = vmax.xlane.f32.xlu0 %v663_v38  ;;  %v659_v40 = vpop.f32.mrb[10].mxu0 }
 0x245   :  { %v660_v41 = vadd.f32 %v659_v40, %v4997_v39  ;;  %v4326_v42 = vpop.f32.mrb[11].mxu0 }
 0x247   :  { %v666_v45 = vsel %vm253_vm2, %v660_v41, -inf  ;;  %v4331_v63 = vpop.f32.mrb[2].mxu1 }
 0x248   :  { %407 = vmax.xlane.f32.xlu0 %v406_v44  ;;  %667 = vmax.xlane.f32.xlu1 %v666_v45  ;;  %v759_v2 = vpop.f32.mrb[3].mxu1 }
 0x249   :  { %4338 = vmatpush3.msra.mxu1 %v4331_v63  ;;  %4333 = vmatpush3.msra.mxu0 %v759_v2 }
 0x24a   :  { %4347 = vmatprep.subr.mxu1 %v4750_v14  ;;  %4342 = vmatprep.subr.mxu0 %v4750_v14 }
 0x24c   :  { %410 = vmax.xlane.f32.xlu0 %v409_v46 }
 0x2d1   :  { %v665_v47 = vpop.xlane.xlu0 %664 }
 0x2d2   :  { %v669_v0 = vsub.f32 %v582_v35, %v665_v47 }
 0x2d4   :  { %v671_v1 = vmul.f32 1.442695, %v669_v0 }
 0x2d5   :  { %v408_v48 = vpop.xlane.xlu0 %407  ;;  %v668_v49 = vpop.xlane.xlu1 %667 }
 0x2d6   :  { %v412_v50 = vsub.f32 %v327_v37, %v408_v48  ;;  %v670_v51 = vsub.f32 %v660_v41, %v668_v49 }
 0x2d8   :  { %v414_v52 = vmul.f32 1.442695, %v412_v50  ;;  %v673_v53 = vmul.f32 1.442695, %v670_v51 }
 0x2d9   :  { %v411_v54 = vpop.xlane.xlu0 %410 }
 0x2da   :  { %4650 = vpow2.f32 %v414_v52  ;;  %v413_v55 = vsub.f32 %v403_v43, %v411_v54 }
 0x2db   :  { %4652 = vpow2.f32 %v673_v53 }
 0x2dc   :  { %v416_v56 = vmul.f32 1.442695, %v413_v55 }
 0x2de   :  { %4654 = vpow2.f32 %v416_v56 }
 0x2df   :  { %4656 = vpow2.f32 %v671_v1 }
 0x2e4   :  { %v4651_v57 = vpop.eup %4650 }
 0x2e5   :  { %v4653_v58 = vpop.eup %4652  ;;  %v418_v59 = vsel %vm253_vm2, %v4651_v57, 0.0 }
 0x2e6   :  { %419 = vadd.xlane.f32.xlu1 %v418_v59  ;;  %v678_v60 = vsel %vm253_vm2, %v4653_v58, 0.0 }
 0x2e7   :  { %679 = vadd.xlane.f32.xlu0 %v678_v60 }
 0x2e8   :  { %v4655_v61 = vpop.eup %4654 }
 0x2e9   :  { %v421_v62 = vsel %vm253_vm2, %v4655_v61, 0.0  ;;  %v4657_v3 = vpop.eup %4656 }
 0x2ea   :  { %v675_v4 = vsel %vm253_vm2, %v4657_v3, 0.0 }
 0x2eb   :  { %422 = vadd.xlane.f32.xlu0 %v421_v62 }
 0x2f7   :  { %1062 = vrot.lane.b32.xlu1 %v4936_v18, %s4753_s5 }
 0x301   :  { %1140 = vrot.lane.b32.xlu0 %v4934_v17, %s4753_s5 }
 0x305   :  { %1238 = vrot.lane.b32.xlu0 %v4893_v5, %s4753_s5 }
 0x31b   :  { %676 = vadd.xlane.f32.xlu1 %v675_v4 }
 0x32c   :  { %1060 = vrot.lane.b32.xlu1 %v4928_v16, %s4753_s5 }
 0x330   :  { %1138 = vrot.lane.b32.xlu1 %v4926_v15, %s4753_s5 }
 0x334   :  { %1240 = vrot.lane.b32.xlu1 %v4912_v12, %s4753_s5 }
 0x373   :  { %v420_v19 = vpop.xlane.xlu1 %419 }
 0x374   :  { %v680_v6 = vpop.xlane.xlu0 %679 }
 0x375   :  { %4658 = vrcp.f32 %v680_v6 }
 0x377   :  { %v1063_v20 = vpop.permute.xlu1 %1062 }
 0x378   :  { %v423_v7 = vpop.xlane.xlu0 %422 }
 0x379   :  { %4660 = vrcp.f32 %v423_v7  ;;  %v94_v7 = vld [vmem:[%s5521_s28 + $0x18] sm:$0xff] }
 0x37c   :  { %v1141_v13 = vpop.permute.xlu0 %1140 }
 0x37f   :  { %v4659_v8 = vpop.eup %4658 }
 0x380   :  { %v684_v9 = vmul.f32 %v4659_v8, %v4653_v58  ;;  %v1239_v28 = vpop.permute.xlu0 %1238 }
 0x382   :  { %4340 = vmatmul.mubr.msk.f32.vlgmr.msra.gmra.mrb[4].mxu1 %vm253_vm2, %v684_v9 }
 0x383   :  { %v4661_v10 = vpop.eup %4660  ;;  %4348 = vmatpush3.msra.mxu1 %v4982_v31  ;;  %4349 = vmatprep.mubr.msk.f32.mxu1 %vm4751_vm1, %v4750_v14 }
 0x384   :  { %v427_v11 = vmul.f32 %v4661_v10, %v4655_v61  ;;  %4357 = vmatprep.subr.mxu1 %v4750_v14 }
 0x386   :  { %4350 = vmatmul.mubr.msk.f32.vlgmr.msra.gmra.mrb[6].mxu1 %vm253_vm2, %v427_v11 }
 0x387   :  { %4359 = vmatprep.mubr.msk.f32.mxu1 %vm4751_vm1, %v4750_v14 }
 0x38a   :  { %4358 = vmatpush3.xpose.msk.msra.mxu1 %vm253_vm2, %v1141_v13 }
 0x38b   :  { %4367 = vmatprep.subr.mxu1 %v4750_v14 }
 0x3a8   :  { %v677_v21 = vpop.xlane.xlu1 %676 }
 0x3a9   :  { %4662 = vrcp.f32 %v677_v21 }
 0x3aa   :  { %4664 = vrcp.f32 %v420_v19 }
 0x3ac   :  { %v1061_v22 = vpop.permute.xlu1 %1060 }
 0x3b0   :  { %v1139_v23 = vpop.permute.xlu1 %1138 }
 0x3b1   :  { %4360 = vmatmul.mubr.msk.f32.vlgmr.msra.gmra.mrb[8].mxu1 %vm253_vm2, %v1139_v23 }
 0x3b2   :  { %4369 = vmatprep.mubr.msk.f32.mxu1 %vm4751_vm1, %v4750_v14 }
 0x3b3   :  { %v4663_v24 = vpop.eup %4662 }
 0x3b4   :  { %v682_v25 = vmul.f32 %v4663_v24, %v4657_v3  ;;  %v4665_v26 = vpop.eup %4664  ;;  %v1241_v30 = vpop.permute.xlu1 %1240 }
 0x3b5   :  { %v425_v27 = vmul.f32 %v4665_v26, %v4651_v57 }
 0x3b6   :  { %4335 = vmatmul.mubr.msk.f32.vlgmr.msra.gmra.mrb[12].mxu0 %vm253_vm2, %v682_v25 }
 0x3b7   :  { %4343 = vmatpush3.msra.mxu0 %v4984_v32  ;;  %4344 = vmatprep.mubr.msk.f32.mxu0 %vm4751_vm1, %v4750_v14 }
 0x3b8   :  { %4352 = vmatprep.subr.mxu0 %v4750_v14 }
 0x3ba   :  { %4345 = vmatmul.mubr.msk.f32.vlgmr.msra.gmra.mrb[14].mxu0 %vm253_vm2, %v425_v27 }
 0x3bb   :  { %4354 = vmatprep.mubr.msk.f32.mxu0 %vm4751_vm1, %v4750_v14 }
 0x3be   :  { %4353 = vmatpush3.xpose.msk.msra.mxu0 %vm253_vm2, %v1063_v20 }
 0x3bf   :  { %4362 = vmatprep.subr.mxu0 %v93_v29 }
 0x3c1   :  { %4355 = vmatmul.mubr.msk.f32.vlgmr.msra.gmra.mrb[16].mxu0 %vm253_vm2, %v1061_v22 }
 0x3c2   :  { %4364 = vmatprep.mubr.msk.f32.mxu0 %vm253_vm2, %v1239_v28  ;;  %4363 = vmatpush3.msra.mxu0 %v93_v29 }
 0x3c3   :  { %4372 = vmatprep.subr.mxu0 %v4750_v14 }
 0x3c5   :  { %4365 = vmatmul.mubr.msk.f32.vlgmr.msra.gmra.mrb[18].mxu0 %vm253_vm2, %v1241_v30 }
 0x3c6   :  { %4374 = vmatprep.mubr.msk.f32.mxu0 %vm4751_vm1, %v4750_v14 }
 0x455   :  { %v910_v31 = vpop.f32.mrb[4].mxu1 }
 0x456   :  { %v4341_v32 = vpop.f32.mrb[5].mxu1 }
 0x459   :  { %v1056_v34 = vpop.f32.mrb[6].mxu1 }
 0x45a   :  { %v5053_v35 = vadd.f32 %v1056_v34, %v910_v31  ;;  %v4351_v36 = vpop.f32.mrb[7].mxu1 }
 0x484   :  { %v1212_v37 = vpop.f32.mrb[8].mxu1 }
 0x485   :  { %v1213_v38 = vadd.f32 %v1212_v37, %v4997_v39  ;;  %v4361_v40 = vpop.f32.mrb[9].mxu1 }
 0x487   :  { %v1219_v41 = vsel %vm253_vm2, %v1213_v38, -inf }
 0x488   :  { %1220 = vmax.xlane.f32.xlu1 %v1219_v41 }
 0x489   :  { %v837_v42 = vpop.f32.mrb[12].mxu0 }
 0x48a   :  { %v4336_v43 = vpop.f32.mrb[13].mxu0 }
 0x48d   :  { %v983_v44 = vpop.f32.mrb[14].mxu0 }
 0x48e   :  { %v5057_v45 = vadd.f32 %v983_v44, %v837_v42  ;;  %v4346_v46 = vpop.f32.mrb[15].mxu0 }
 0x494   :  { %v1134_v47 = vpop.f32.mrb[16].mxu0 }
 0x495   :  { %v1135_v48 = vadd.f32 %v1134_v47, %v4989_v33  ;;  %v4356_v49 = vpop.f32.mrb[17].mxu0  ;;  %v4094_v47 = vld [vmem:[%s5486_s8] ss:$0 sm:$0xff] }
 0x497   :  { %v1216_v50 = vsel %vm253_vm2, %v1135_v48, -inf }
 0x498   :  { %1217 = vmax.xlane.f32.xlu0 %v1216_v50 }
 0x499   :  { %1471 = vrot.lane.b32.xlu1 %v4936_v18, %s4754_s2 }
 0x49d   :  { %1469 = vrot.lane.b32.xlu1 %v4928_v16, %s4754_s2 }
 0x4a1   :  { %1547 = vrot.lane.b32.xlu1 %v4926_v15, %s4754_s2  ;;  %v4366_v15 = vpop.f32.mrb[18].mxu0 }
 0x4a2   :  { %v1312_v59 = vpop.f32.mrb[19].mxu0  ;;  %4373 = vmatpush3.msra.mxu0 %v4366_v15 }
 0x4a3   :  { %4368 = vmatpush3.msra.mxu1 %v1312_v59  ;;  %4382 = vmatprep.subr.mxu0 %v4750_v14 }
 0x4a4   :  { %4377 = vmatprep.subr.mxu1 %v4750_v14 }
 0x4a5   :  { %1649 = vrot.lane.b32.xlu1 %v4912_v12, %s4754_s2 }
 0x515   :  { %v1221_v51 = vpop.xlane.xlu1 %1220 }
 0x516   :  { %v1223_v52 = vsub.f32 %v1213_v38, %v1221_v51 }
 0x518   :  { %v1226_v53 = vmul.f32 1.442695, %v1223_v52 }
 0x519   :  { %v1472_v62 = vpop.permute.xlu1 %1471 }
 0x51a   :  { %4666 = vpow2.f32 %v1226_v53 }
 0x51d   :  { %v1470_v1 = vpop.permute.xlu1 %1469 }
 0x524   :  { %v4667_v54 = vpop.eup %4666 }
 0x525   :  { %v1218_v55 = vpop.xlane.xlu0 %1217  ;;  %v1231_v56 = vsel %vm253_vm2, %v4667_v54, 0.0 }
 0x526   :  { %v1222_v57 = vsub.f32 %v1135_v48, %v1218_v55  ;;  %1232 = vadd.xlane.f32.xlu0 %v1231_v56 }
 0x528   :  { %v1224_v18 = vmul.f32 1.442695, %v1222_v57 }
 0x52a   :  { %4668 = vpow2.f32 %v1224_v18 }
 0x534   :  { %v4669_v58 = vpop.eup %4668 }
 0x535   :  { %v1228_v16 = vsel %vm253_vm2, %v4669_v58, 0.0 }
 0x536   :  { %1229 = vadd.xlane.f32.xlu0 %v1228_v16 }
 0x54c   :  { %1549 = vrot.lane.b32.xlu0 %v4934_v17, %s4754_s2  ;;  %v1548_v17 = vpop.permute.xlu1 %1547 }
 0x550   :  { %1647 = vrot.lane.b32.xlu0 %v4893_v5, %s4754_s2  ;;  %v1650_v8 = vpop.permute.xlu1 %1649 }
 0x5b3   :  { %v1233_v60 = vpop.xlane.xlu0 %1232 }
 0x5b4   :  { %4670 = vrcp.f32 %v1233_v60 }
 0x5be   :  { %v4671_v61 = vpop.eup %4670 }
 0x5bf   :  { %v1237_v63 = vmul.f32 %v4671_v61, %v4667_v54 }
 0x5c1   :  { %4375 = vmatmul.mubr.msk.f32.vlgmr.msra.gmra.mrb[20].mxu0 %vm253_vm2, %v1237_v63 }
 0x5c2   :  { %4384 = vmatprep.mubr.msk.f32.mxu0 %vm4751_vm1, %v4750_v14 }
 0x5c3   :  { %v1230_v0 = vpop.xlane.xlu0 %1229 }
 0x5c4   :  { %4672 = vrcp.f32 %v1230_v0 }
 0x5c7   :  { %v1550_v2 = vpop.permute.xlu0 %1549 }
 0x5c8   :  { %4383 = vmatpush3.xpose.msk.msra.mxu0 %vm253_vm2, %v1550_v2  ;;  %v1940_v2 = vld [vmem:[%s5490_s12 + $0x8] sm:$0xff] }
 0x5c9   :  { %4392 = vmatprep.subr.mxu0 %v4750_v14 }
 0x5cb   :  { %4385 = vmatmul.mubr.msk.f32.vlgmr.msra.gmra.mrb[22].mxu0 %vm253_vm2, %v1548_v17  ;;  %v1648_v6 = vpop.permute.xlu0 %1647 }
 0x5cc   :  { %4394 = vmatprep.mubr.msk.f32.mxu0 %vm4751_vm1, %v4750_v14 }
 0x5ce   :  { %v4673_v3 = vpop.eup %4672 }
 0x5cf   :  { %v1235_v4 = vmul.f32 %v4673_v3, %v4669_v58  ;;  %v1941_v3 = vld [vmem:[%s5490_s12 + $0x10] sm:$0xff] }
 0x5d1   :  { %4370 = vmatmul.mubr.msk.f32.vlgmr.msra.gmra.mrb[10].mxu1 %vm253_vm2, %v1235_v4  ;;  %v1942_v4 = vld [vmem:[%s5490_s12 + $0x18] sm:$0xff] }
 0x5d2   :  { %4378 = vmatpush3.xpose.msk.msra.mxu1 %vm253_vm2, %v1472_v62  ;;  %4379 = vmatprep.mubr.msk.f32.mxu1 %vm4751_vm1, %v4750_v14 }
 0x5d3   :  { %4387 = vmatprep.subr.mxu1 %v94_v7 }
 0x5d5   :  { %4380 = vmatmul.mubr.msk.f32.vlgmr.msra.gmra.mrb[12].mxu1 %vm253_vm2, %v1470_v1 }
 0x5d6   :  { %4389 = vmatprep.mubr.msk.f32.mxu1 %vm253_vm2, %v1648_v6  ;;  %4388 = vmatpush3.msra.mxu1 %v94_v7  ;;  %v4598_v6 = vpack.c.bf16 %v1942_v4, %v1941_v3  ;;  %v1935_v7 = vld [vmem:[%s5489_s11] sm:$0xff] }
 0x5d7   :  { %4397 = vmatprep.subr.mxu1 %v4750_v14 }
 0x5d9   :  { %4390 = vmatmul.mubr.msk.f32.vlgmr.msra.gmra.mrb[14].mxu1 %vm253_vm2, %v1650_v8  ;;  %v1936_v8 = vld [vmem:[%s5489_s11 + $0x8] sm:$0xff] }
 0x5da   :  { %4399 = vmatprep.mubr.msk.f32.mxu1 %vm4751_vm1, %v4750_v14 }
 0x694   :  { %v1463_v9 = vpop.f32.mrb[20].mxu0 }
 0x695   :  { %v1468_v10 = vadd.f32 %v1463_v9, %v5053_v35  ;;  %v4376_v11 = vpop.f32.mrb[21].mxu0  ;;  %v4586_v9 = vpack.c.bf16 %v1936_v8, %v1935_v7 }
 0x696   :  { %v80_v11 = vld [vmem:[%s5523_s3 + $0x8] sm:$0xff] }
 0x69e   :  { %v1621_v13 = vpop.f32.mrb[22].mxu0 }
 0x69f   :  { %v1622_v19 = vadd.f32 %v1621_v13, %v4997_v39  ;;  %v4386_v20 = vpop.f32.mrb[23].mxu0  ;;  %v1937_v13 = vld [vmem:[%s5489_s11 + $0x10] sm:$0xff] }
 0x6a1   :  { %v1628_v21 = vsel %vm253_vm2, %v1622_v19, -inf }
 0x6a2   :  { %1629 = vmax.xlane.f32.xlu1 %v1628_v21 }
 0x6a4   :  { %v1390_v22 = vpop.f32.mrb[10].mxu1 }
 0x6a5   :  { %v1467_v23 = vadd.f32 %v1390_v22, %v5057_v45  ;;  %v4371_v24 = vpop.f32.mrb[11].mxu1 }
 0x6a8   :  { %v1543_v25 = vpop.f32.mrb[12].mxu1 }
 0x6a9   :  { %v1544_v26 = vadd.f32 %v1543_v25, %v4989_v33  ;;  %v4381_v27 = vpop.f32.mrb[13].mxu1 }
 0x6ab   :  { %v1625_v28 = vsel %vm253_vm2, %v1544_v26, -inf }
 0x6ac   :  { %1626 = vmax.xlane.f32.xlu0 %v1625_v28  ;;  %v4391_v29 = vpop.f32.mrb[14].mxu1  ;;  %v4095_v28 = vld [vmem:[%s5487_s9] ss:$0 sm:$0xff]  ;;  %s4047_s9 = sshll.u32 %s4755_s27, 4  ;;  %s4048_s9 = int_to_ptr.vmem [resolvable:$true] %s4047_s9 }
 0x6ad   :  { %v1721_v30 = vpop.f32.mrb[15].mxu1  ;;  %4398 = vmatpush3.msra.mxu1 %v4391_v29  ;;  %p4731_p1 = scmp.lt.s32.totalorder %s4048_s9, %s4048_s9 }
 0x6ae   :  { %4393 = vmatpush3.msra.mxu0 %v1721_v30  ;;  %v4096_v30 = vld [vmem:[%s5488_s10] ss:$0 sm:$0xff]  ;;  %s4726_s10 = scalar_lea.vmem %s4048_s9, 256 }
 0x6af   :  { %4587 = vmatprep.subr.bf16.mxu0 %v4586_v9  ;;  %p4727_p0 = scmp.ne.s32.totalorder %s4048_s9, %s4726_s10  ;;  %p4732_p2 = scmp.lt.s32.totalorder %s4726_s10, %s4726_s10 }
 0x6b1   :  { %p4733_p3 = por %p4732_p2, %p4731_p1 }
 0x6b3   :  { %p4734_p4 = pnand %p4733_p3, %p4727_p0 }
 0x72f   :  { %v1630_v39 = vpop.xlane.xlu1 %1629 }
 0x730   :  { %v1632_v31 = vsub.f32 %v1622_v19, %v1630_v39  ;;  %v1938_v19 = vld [vmem:[%s5489_s11 + $0x18] sm:$0xff] }
 0x731   :  { %v4590_v20 = vpack.c.bf16 %v1938_v19, %v1937_v13 }
 0x732   :  { %v1635_v35 = vmul.f32 1.442695, %v1632_v31 }
 0x739   :  { %v1627_v32 = vpop.xlane.xlu0 %1626 }
 0x73a   :  { %v1631_v34 = vsub.f32 %v1544_v26, %v1627_v32 }
 0x73c   :  { %v1633_v36 = vmul.f32 1.442695, %v1631_v34 }
 0x73e   :  { %4674 = vpow2.f32 %v1633_v36 }
 0x73f   :  { %4676 = vpow2.f32 %v1635_v35 }
 0x748   :  { %v4675_v37 = vpop.eup %4674 }
 0x749   :  { %v1637_v38 = vsel %vm253_vm2, %v4675_v37, 0.0  ;;  %v4677_v33 = vpop.eup %4676 }
 0x74a   :  { %1638 = vadd.xlane.f32.xlu0 %v1637_v38  ;;  %v1640_v40 = vsel %vm253_vm2, %v4677_v33, 0.0 }
 0x74e   :  { %1641 = vadd.xlane.f32.xlu0 %v1640_v40  ;;  %v5188_v40 = vld [vmem:[%s5524_s29] sm:$0xff] }
 0x7d7   :  { %v1639_v41 = vpop.xlane.xlu0 %1638 }
 0x7d8   :  { %4678 = vrcp.f32 %v1639_v41 }
 0x7db   :  { %v1642_v42 = vpop.xlane.xlu0 %1641 }
 0x7dc   :  { %4680 = vrcp.f32 %v1642_v42 }
 0x7e2   :  { %v4679_v43 = vpop.eup %4678 }
 0x7e3   :  { %v1644_v44 = vmul.f32 %v4679_v43, %v4675_v37 }
 0x7e5   :  { %4395 = vmatmul.mubr.msk.f32.vlgmr.msra.gmra.mrb[24].mxu0 %vm253_vm2, %v1644_v44  ;;  %v5207_v44 = vld [vmem:[%s5524_s29 + $0x8] sm:$0xff] }
 0x7e6   :  { %v4681_v45 = vpop.eup %4680  ;;  %4589 = vmatpush3.bf16.msra.mxu0 %v4586_v9 }
 0x7e7   :  { %v1646_v46 = vmul.f32 %v4681_v45, %v4677_v33  ;;  %4591 = vmatprep.subr.bf16.mxu0 %v4590_v20  ;;  %v1943_v33 = vld [vmem:[%s5491_s13] sm:$0xff] }
 0x7e9   :  { %4400 = vmatmul.mubr.msk.f32.vlgmr.msra.gmra.mrb[16].mxu1 %vm253_vm2, %v1646_v46 }
 0x7ea   :  { %4593 = vmatpush3.bf16.msra.mxu0 %v4590_v20 }
 0x7eb   :  { %4424 = vmatprep.subr.mxu0 %v4750_v14 }
 0x8b8   :  { %v1799_v48 = vpop.f32.mrb[24].mxu0 }
 0x8b9   :  { %v1876_v49 = vadd.f32 %v1799_v48, %v1467_v23  ;;  %v4396_v50 = vpop.f32.mrb[25].mxu0 }
 0x8ba   :  { %v1944_v50 = vld [vmem:[%s5491_s13 + $0x8] sm:$0xff] }
 0x8bb   :  { %v1884_v51 = vadd.f32 %v4094_v47, %v1876_v49 }
 0x8bc   :  { %v1872_v52 = vpop.f32.mrb[16].mxu1 }
 0x8bd   :  { %v1877_v53 = vadd.f32 %v1872_v52, %v1468_v10  ;;  %v4401_v54 = vpop.f32.mrb[17].mxu1  ;;  %v1886_v55 = vadd.f32 %v1884_v51, %v4893_v5  ;;  %v79_v10 = vld [vmem:[%s5523_s3] sm:$0xff] }
 0x8be   :  { %4421 = vmatprep.mubr.msk.f32.mxu1 %vm96_vm0, %v79_v10 }
 0x8bf   :  { %v1885_v56 = vadd.f32 %v4094_v47, %v1877_v53  ;;  %v1890_v57 = vsel %vm96_vm0, %v1886_v55, 0.0 }
 0x8c0   :  { %1891 = vadd.xlane.f32.xlu1 %v1890_v57  ;;  %v5242_v57 = vld [vmem:[%s5525_s30] ss:$0 sm:$0xff] }
 0x8c1   :  { %v1887_v18 = vadd.f32 %v1885_v56, %v4912_v12  ;;  %v1939_v12 = vld [vmem:[%s5490_s12] sm:$0xff] }
 0x8c2   :  { %v4594_v17 = vpack.c.bf16 %v1940_v2, %v1939_v12 }
 0x8c3   :  { %v1893_v58 = vsel %vm96_vm0, %v1887_v18, 0.0 }
 0x8c4   :  { %1894 = vadd.xlane.f32.xlu0 %v1893_v58  ;;  %4595 = vmatprep.subr.bf16.mxu1 %v4594_v17 }
 0x8c5   :  { %4597 = vmatpush3.bf16.msra.mxu1 %v4594_v17 }
 0x8c6   :  { %4599 = vmatprep.subr.bf16.mxu1 %v4598_v6 }
 0x8c9   :  { %4601 = vmatpush3.bf16.msra.mxu1 %v4598_v6 }
 0x8ca   :  { %4429 = vmatprep.subr.mxu1 %v4750_v14 }
 0x8cc   :  { %4422 = vmatmul.mubr.msk.f32.vlgmr.msra.gmra.mrb[18].mxu1 %vm96_vm0, %v80_v11 }
 0x8cd   :  { %4431 = vmatprep.mubr.msk.f32.mxu1 %vm4751_vm1, %v4750_v14 }
 0x94d   :  { %v1892_v16 = vpop.xlane.xlu1 %1891 }
 0x94e   :  { %v1897_v15 = vmul.f32 0.03125, %v1892_v16 }
 0x950   :  { %v1899_v59 = vsub.f32 %v1886_v55, %v1897_v15 }
 0x951   :  { %v1895_v60 = vpop.xlane.xlu0 %1894 }
 0x952   :  { %v1898_v61 = vmul.f32 0.03125, %v1895_v60  ;;  %v1901_v62 = vmul.f32 %v1899_v59, %v1899_v59  ;;  %v5250_v60 = vld [vmem:[%s5525_s30 + $0x1] ss:$0 sm:$0xff] }
 0x954   :  { %v1900_v63 = vsub.f32 %v1887_v18, %v1898_v61  ;;  %v1903_v0 = vsel %vm96_vm0, %v1901_v62, 0.0 }
 0x955   :  { %1904 = vadd.xlane.f32.xlu1 %v1903_v0 }
 0x956   :  { %v1902_v5 = vmul.f32 %v1900_v63, %v1900_v63 }
 0x958   :  { %v1906_v1 = vsel %vm96_vm0, %v1902_v5, 0.0 }
 0x959   :  { %1907 = vadd.xlane.f32.xlu0 %v1906_v1 }
 0x99f   :  { %v5169_v37 = vpop.f32.mrb[18].mxu1 }
 0x9a0   :  { %v5171_v38 = vpop.f32.mrb[19].mxu1  ;;  %2457 = vrot.lane.b32.xlu0 %v5169_v37, %s4752_s6  ;;  %4430 = vmatpush3.xpose.msk.msra.mxu1 %vm253_vm2, %v5169_v37 }
 0x9a1   :  { %2379 = vrot.lane.b32.xlu1 %v5171_v38, %s4752_s6  ;;  %4439 = vmatprep.subr.mxu1 %v4750_v14 }
 0x9a4   :  { %2555 = vrot.lane.b32.xlu0 %v5188_v40, %s4752_s6 }
 0x9e2   :  { %v1905_v21 = vpop.xlane.xlu1 %1904 }
 0x9e3   :  { %v1909_v22 = vmul.f32 0.03125, %v1905_v21 }
 0x9e5   :  { %v1911_v23 = vadd.f32 1e-05, %v1909_v22 }
 0x9e6   :  { %v1908_v24 = vpop.xlane.xlu0 %1907 }
 0x9e7   :  { %4682 = vrsqrt.f32 %v1911_v23  ;;  %v1910_v25 = vmul.f32 0.03125, %v1908_v24 }
 0x9e9   :  { %v1912_v26 = vadd.f32 1e-05, %v1910_v25 }
 0x9eb   :  { %4684 = vrsqrt.f32 %v1912_v26 }
 0x9f1   :  { %v4683_v27 = vpop.eup %4682 }
 0x9f2   :  { %v1915_v29 = vmul.f32 %v4683_v27, %v1899_v59 }
 0x9f4   :  { %v1923_v39 = vmul.f32 %v4095_v28, %v1915_v29 }
 0x9f5   :  { %v4685_v31 = vpop.eup %4684 }
 0x9f6   :  { %v1916_v32 = vmul.f32 %v4685_v31, %v1900_v63  ;;  %v5159_v34 = vadd.f32 %v4096_v30, %v1923_v39 }
 0x9f8   :  { %v1924_v35 = vmul.f32 %v4095_v28, %v1916_v32  ;;  %4410 = vmatprep.mubr.msk.f32.mxu0 %vm96_vm0, %v5159_v34 }
 0x9fa   :  { %v5163_v36 = vadd.f32 %v4096_v30, %v1924_v35 }
 0x9fc   :  { %4411 = vmatmul.mubr.msk.f32.vlgmr.msra.gmra.mrb[26].mxu0 %vm96_vm0, %v5163_v36 }
 0x9fd   :  { %4426 = vmatprep.mubr.msk.f32.mxu0 %vm4751_vm1, %v4750_v14  ;;  %4425 = vmatpush3.xpose.msk.msra.mxu0 %vm253_vm2, %v5171_v38 }
 0x9fe   :  { %4434 = vmatprep.subr.mxu0 %v1943_v33 }
 0xa12   :  { %v2458_v45 = vpop.permute.xlu0 %2457 }
 0xa13   :  { %v2380_v43 = vpop.permute.xlu1 %2379 }
 0xa16   :  { %v2556_v49 = vpop.permute.xlu0 %2555 }
 0xacf   :  { %v5192_v41 = vpop.f32.mrb[26].mxu0 }
 0xad0   :  { %v5194_v42 = vpop.f32.mrb[27].mxu0  ;;  %4432 = vmatmul.mubr.msk.f32.vlgmr.msra.gmra.mrb[20].mxu1 %vm253_vm2, %v5192_v41 }
 0xad1   :  { %2377 = vrot.lane.b32.xlu1 %v5194_v42, %s4752_s6  ;;  %4427 = vmatmul.mubr.msk.f32.vlgmr.msra.gmra.mrb[28].mxu0 %vm253_vm2, %v5194_v42 }
 0xad2   :  { %4435 = vmatpush3.msra.mxu0 %v1943_v33  ;;  %4436 = vmatprep.mubr.msk.f32.mxu0 %vm253_vm2, %v5188_v40 }
 0xad3   :  { %4444 = vmatprep.subr.mxu0 %v4750_v14  ;;  %4440 = vmatpush3.xpose.msk.msra.mxu1 %vm253_vm2, %v2380_v43 }
 0xad4   :  { %4441 = vmatprep.mubr.msk.f32.mxu1 %vm4751_vm1, %v4750_v14  ;;  %4449 = vmatprep.subr.mxu1 %v1944_v50 }
 0xad5   :  { %2455 = vrot.lane.b32.xlu1 %v5192_v41, %s4752_s6  ;;  %4437 = vmatmul.mubr.msk.f32.vlgmr.msra.gmra.mrb[30].mxu0 %vm253_vm2, %v5207_v44 }
 0xad6   :  { %4446 = vmatprep.mubr.msk.f32.mxu0 %vm4751_vm1, %v4750_v14 }
 0xad9   :  { %4445 = vmatpush3.xpose.msk.msra.mxu0 %vm253_vm2, %v2458_v45  ;;  %2557 = vrot.lane.b32.xlu1 %v5207_v44, %s4752_s6 }
 0xada   :  { %4454 = vmatprep.subr.mxu0 %v4750_v14 }
 0xb43   :  { %v2378_v46 = vpop.permute.xlu1 %2377 }
 0xb44   :  { %4442 = vmatmul.mubr.msk.f32.vlgmr.msra.gmra.mrb[22].mxu1 %vm253_vm2, %v2378_v46 }
 0xb45   :  { %4451 = vmatprep.mubr.msk.f32.mxu1 %vm253_vm2, %v2556_v49  ;;  %4450 = vmatpush3.msra.mxu1 %v1944_v50 }
 0xb46   :  { %4459 = vmatprep.subr.mxu1 %v4750_v14 }
 0xb47   :  { %v2456_v47 = vpop.permute.xlu1 %2455 }
 0xb48   :  { %4447 = vmatmul.mubr.msk.f32.vlgmr.msra.gmra.mrb[32].mxu0 %vm253_vm2, %v2456_v47 }
 0xb49   :  { %4456 = vmatprep.mubr.msk.f32.mxu0 %vm4751_vm1, %v4750_v14 }
 0xb4b   :  { %v2558_v54 = vpop.permute.xlu1 %2557 }
 0xb4c   :  { %4452 = vmatmul.mubr.msk.f32.vlgmr.msra.gmra.mrb[24].mxu1 %vm253_vm2, %v2558_v54 }
 0xb4d   :  { %4461 = vmatprep.mubr.msk.f32.mxu1 %vm4751_vm1, %v4750_v14 }
 0xba3   :  { %v2270_v48 = vpop.f32.mrb[20].mxu1 }
 0xba4   :  { %v2194_v51 = vpop.f32.mrb[28].mxu0  ;;  %v4433_v52 = vpop.f32.mrb[21].mxu1  ;;  %v2271_v0 = vadd.f32 %v5250_v60, %v2270_v48 }
 0xba5   :  { %v4428_v53 = vpop.f32.mrb[29].mxu0  ;;  %v2195_v15 = vadd.f32 %v5242_v57, %v2194_v51 }
 0xba6   :  { %v2277_v12 = vsel %vm253_vm2, %v2271_v0, -inf }
 0xba7   :  { %v2274_v5 = vsel %vm253_vm2, %v2195_v15, -inf }
 0xba8   :  { %v5235_v55 = vpop.f32.mrb[30].mxu0 }
 0xba9   :  { %v5237_v56 = vpop.f32.mrb[31].mxu0 }
 0xc17   :  { %v2451_v18 = vpop.f32.mrb[22].mxu1 }
 0xc18   :  { %v2452_v58 = vadd.f32 %v5242_v57, %v2451_v18  ;;  %v4443_v16 = vpop.f32.mrb[23].mxu1 }
 0xc1a   :  { %v2533_v59 = vsel %vm253_vm2, %v2452_v58, -inf }
 0xc1b   :  { %2534 = vmax.xlane.f32.xlu0 %v2533_v59  ;;  %v2529_v61 = vpop.f32.mrb[32].mxu0 }
 0xc1c   :  { %v2530_v62 = vadd.f32 %v5250_v60, %v2529_v61  ;;  %v4448_v63 = vpop.f32.mrb[33].mxu0 }
 0xc1e   :  { %v2536_v1 = vsel %vm253_vm2, %v2530_v62, -inf }
 0xc1f   :  { %2275 = vmax.xlane.f32.xlu0 %v2274_v5  ;;  %2537 = vmax.xlane.f32.xlu1 %v2536_v1  ;;  %v4453_v24 = vpop.f32.mrb[24].mxu1 }
 0xc20   :  { %4460 = vmatpush3.msra.mxu1 %v4453_v24  ;;  %v2629_v27 = vpop.f32.mrb[25].mxu1 }
 0xc21   :  { %4469 = vmatprep.subr.mxu1 %v4750_v14  ;;  %4455 = vmatpush3.msra.mxu0 %v2629_v27 }
 0xc22   :  { %4464 = vmatprep.subr.mxu0 %v4750_v14 }
 0xc23   :  { %2278 = vmax.xlane.f32.xlu0 %v2277_v12 }
 0xca8   :  { %v2535_v2 = vpop.xlane.xlu0 %2534 }
 0xca9   :  { %v2539_v25 = vsub.f32 %v2452_v58, %v2535_v2 }
 0xcab   :  { %v2541_v26 = vmul.f32 1.442695, %v2539_v25 }
 0xcac   :  { %v2276_v17 = vpop.xlane.xlu0 %2275  ;;  %v2538_v3 = vpop.xlane.xlu1 %2537 }
 0xcad   :  { %v2280_v4 = vsub.f32 %v2195_v15, %v2276_v17  ;;  %v2540_v6 = vsub.f32 %v2530_v62, %v2538_v3 }
 0xcaf   :  { %v2282_v7 = vmul.f32 1.442695, %v2280_v4  ;;  %v2543_v8 = vmul.f32 1.442695, %v2540_v6 }
 0xcb0   :  { %v2279_v9 = vpop.xlane.xlu0 %2278 }
 0xcb1   :  { %4686 = vpow2.f32 %v2282_v7  ;;  %v2281_v10 = vsub.f32 %v2271_v0, %v2279_v9 }
 0xcb2   :  { %4688 = vpow2.f32 %v2543_v8 }
 0xcb3   :  { %v2284_v11 = vmul.f32 1.442695, %v2281_v10 }
 0xcb5   :  { %4690 = vpow2.f32 %v2284_v11 }
 0xcb6   :  { %4692 = vpow2.f32 %v2541_v26 }
 0xcbb   :  { %v4687_v13 = vpop.eup %4686 }
 0xcbc   :  { %v4689_v19 = vpop.eup %4688  ;;  %v2286_v20 = vsel %vm253_vm2, %v4687_v13, 0.0 }
 0xcbd   :  { %2287 = vadd.xlane.f32.xlu1 %v2286_v20  ;;  %v2548_v21 = vsel %vm253_vm2, %v4689_v19, 0.0 }
 0xcbe   :  { %2549 = vadd.xlane.f32.xlu0 %v2548_v21 }
 0xcbf   :  { %v4691_v22 = vpop.eup %4690 }
 0xcc0   :  { %v2289_v23 = vsel %vm253_vm2, %v4691_v22, 0.0  ;;  %v4693_v28 = vpop.eup %4692 }
 0xcc1   :  { %v2545_v29 = vsel %vm253_vm2, %v4693_v28, 0.0 }
 0xcc2   :  { %2290 = vadd.xlane.f32.xlu0 %v2289_v23 }
 0xcce   :  { %2932 = vrot.lane.b32.xlu1 %v5171_v38, %s4753_s5 }
 0xcd8   :  { %3010 = vrot.lane.b32.xlu0 %v5169_v37, %s4753_s5 }
 0xcdc   :  { %3108 = vrot.lane.b32.xlu0 %v5188_v40, %s4753_s5 }
 0xcf2   :  { %2546 = vadd.xlane.f32.xlu1 %v2545_v29 }
 0xd03   :  { %2930 = vrot.lane.b32.xlu1 %v5194_v42, %s4753_s5 }
 0xd07   :  { %3008 = vrot.lane.b32.xlu1 %v5192_v41, %s4753_s5 }
 0xd0b   :  { %3110 = vrot.lane.b32.xlu1 %v5207_v44, %s4753_s5 }
 0xd4a   :  { %v2288_v45 = vpop.xlane.xlu1 %2287 }
 0xd4b   :  { %v2550_v30 = vpop.xlane.xlu0 %2549 }
 0xd4c   :  { %4694 = vrcp.f32 %v2550_v30 }
 0xd4e   :  { %v2933_v46 = vpop.permute.xlu1 %2932 }
 0xd4f   :  { %v2291_v39 = vpop.xlane.xlu0 %2290 }
 0xd50   :  { %4696 = vrcp.f32 %v2291_v39  ;;  %v1946_v39 = vld [vmem:[%s5491_s13 + $0x18] sm:$0xff] }
 0xd53   :  { %v3011_v43 = vpop.permute.xlu0 %3010 }
 0xd56   :  { %v4695_v31 = vpop.eup %4694 }
 0xd57   :  { %v2554_v32 = vmul.f32 %v4695_v31, %v4689_v19  ;;  %v3109_v54 = vpop.permute.xlu0 %3108 }
 0xd59   :  { %4462 = vmatmul.mubr.msk.f32.vlgmr.msra.gmra.mrb[26].mxu1 %vm253_vm2, %v2554_v32 }
 0xd5a   :  { %v4697_v35 = vpop.eup %4696  ;;  %4470 = vmatpush3.msra.mxu1 %v5235_v55  ;;  %4471 = vmatprep.mubr.msk.f32.mxu1 %vm4751_vm1, %v4750_v14  ;;  %v1945_v55 = vld [vmem:[%s5491_s13 + $0x10] sm:$0xff] }
 0xd5b   :  { %v2295_v33 = vmul.f32 %v4697_v35, %v4691_v22  ;;  %4479 = vmatprep.subr.mxu1 %v4750_v14 }
 0xd5d   :  { %4472 = vmatmul.mubr.msk.f32.vlgmr.msra.gmra.mrb[28].mxu1 %vm253_vm2, %v2295_v33 }
 0xd5e   :  { %4481 = vmatprep.mubr.msk.f32.mxu1 %vm4751_vm1, %v4750_v14 }
 0xd61   :  { %4480 = vmatpush3.xpose.msk.msra.mxu1 %vm253_vm2, %v3011_v43 }
 0xd62   :  { %4489 = vmatprep.subr.mxu1 %v4750_v14 }
 0xd7f   :  { %v2547_v47 = vpop.xlane.xlu1 %2546 }
 0xd80   :  { %4698 = vrcp.f32 %v2547_v47 }
 0xd81   :  { %4700 = vrcp.f32 %v2288_v45 }
 0xd83   :  { %v2931_v48 = vpop.permute.xlu1 %2930 }
 0xd87   :  { %v3009_v49 = vpop.permute.xlu1 %3008 }
 0xd88   :  { %4482 = vmatmul.mubr.msk.f32.vlgmr.msra.gmra.mrb[30].mxu1 %vm253_vm2, %v3009_v49 }
 0xd89   :  { %4491 = vmatprep.mubr.msk.f32.mxu1 %vm4751_vm1, %v4750_v14 }
 0xd8a   :  { %v4699_v50 = vpop.eup %4698 }
 0xd8b   :  { %v2552_v51 = vmul.f32 %v4699_v50, %v4693_v28  ;;  %v4701_v52 = vpop.eup %4700 }
 0xd8c   :  { %v2293_v53 = vmul.f32 %v4701_v52, %v4687_v13 }
 0xd8d   :  { %4457 = vmatmul.mubr.msk.f32.vlgmr.msra.gmra.mrb[34].mxu0 %vm253_vm2, %v2552_v51 }
 0xd8e   :  { %4465 = vmatpush3.msra.mxu0 %v5237_v56  ;;  %4466 = vmatprep.mubr.msk.f32.mxu0 %vm4751_vm1, %v4750_v14  ;;  %v3111_v56 = vpop.permute.xlu1 %3110 }
 0xd8f   :  { %4474 = vmatprep.subr.mxu0 %v4750_v14 }
 0xd91   :  { %4467 = vmatmul.mubr.msk.f32.vlgmr.msra.gmra.mrb[36].mxu0 %vm253_vm2, %v2293_v53 }
 0xd92   :  { %4476 = vmatprep.mubr.msk.f32.mxu0 %vm4751_vm1, %v4750_v14 }
 0xd95   :  { %4475 = vmatpush3.xpose.msk.msra.mxu0 %vm253_vm2, %v2933_v46 }
 0xd96   :  { %4484 = vmatprep.subr.mxu0 %v1945_v55 }
 0xd98   :  { %4477 = vmatmul.mubr.msk.f32.vlgmr.msra.gmra.mrb[38].mxu0 %vm253_vm2, %v2931_v48 }
 0xd99   :  { %4486 = vmatprep.mubr.msk.f32.mxu0 %vm253_vm2, %v3109_v54  ;;  %4485 = vmatpush3.msra.mxu0 %v1945_v55 }
 0xd9a   :  { %4494 = vmatprep.subr.mxu0 %v4750_v14 }
 0xd9c   :  { %4487 = vmatmul.mubr.msk.f32.vlgmr.msra.gmra.mrb[40].mxu0 %vm253_vm2, %v3111_v56 }
 0xd9d   :  { %4496 = vmatprep.mubr.msk.f32.mxu0 %vm4751_vm1, %v4750_v14 }
 0xe2c   :  { %v2780_v18 = vpop.f32.mrb[26].mxu1 }
 0xe2d   :  { %v4463_v58 = vpop.f32.mrb[27].mxu1 }
 0xe30   :  { %v2926_v16 = vpop.f32.mrb[28].mxu1 }
 0xe31   :  { %v5306_v15 = vadd.f32 %v2926_v16, %v2780_v18  ;;  %v4473_v59 = vpop.f32.mrb[29].mxu1 }
 0xe5b   :  { %v3082_v61 = vpop.f32.mrb[30].mxu1 }
 0xe5c   :  { %v3083_v62 = vadd.f32 %v5250_v60, %v3082_v61  ;;  %v4483_v63 = vpop.f32.mrb[31].mxu1 }
 0xe5e   :  { %v3089_v0 = vsel %vm253_vm2, %v3083_v62, -inf }
 0xe5f   :  { %3090 = vmax.xlane.f32.xlu1 %v3089_v0 }
 0xe60   :  { %v2707_v5 = vpop.f32.mrb[34].mxu0 }
 0xe61   :  { %v4458_v1 = vpop.f32.mrb[35].mxu0 }
 0xe64   :  { %v2853_v12 = vpop.f32.mrb[36].mxu0 }
 0xe65   :  { %v5310_v2 = vadd.f32 %v2853_v12, %v2707_v5  ;;  %v4468_v17 = vpop.f32.mrb[37].mxu0 }
 0xe66   :  { %v4135_v17 = vld [vmem:[%s5492_s14] ss:$0 sm:$0xff] }
 0xe6b   :  { %v3004_v3 = vpop.f32.mrb[38].mxu0 }
 0xe6c   :  { %v3005_v4 = vadd.f32 %v5242_v57, %v3004_v3  ;;  %v4478_v6 = vpop.f32.mrb[39].mxu0 }
 0xe6e   :  { %v3086_v7 = vsel %vm253_vm2, %v3005_v4, -inf }
 0xe6f   :  { %3087 = vmax.xlane.f32.xlu0 %v3086_v7 }
 0xe70   :  { %3341 = vrot.lane.b32.xlu1 %v5171_v38, %s4754_s2 }
 0xe74   :  { %3339 = vrot.lane.b32.xlu1 %v5194_v42, %s4754_s2 }
 0xe78   :  { %3417 = vrot.lane.b32.xlu1 %v5192_v41, %s4754_s2  ;;  %v4488_v41 = vpop.f32.mrb[40].mxu0 }
 0xe79   :  { %v3182_v22 = vpop.f32.mrb[41].mxu0  ;;  %4495 = vmatpush3.msra.mxu0 %v4488_v41 }
 0xe7a   :  { %4490 = vmatpush3.msra.mxu1 %v3182_v22  ;;  %4504 = vmatprep.subr.mxu0 %v4750_v14 }
 0xe7b   :  { %4499 = vmatprep.subr.mxu1 %v4750_v14 }
 0xe7c   :  { %3519 = vrot.lane.b32.xlu1 %v5207_v44, %s4754_s2 }
 0xeec   :  { %v3091_v8 = vpop.xlane.xlu1 %3090 }
 0xeed   :  { %v3093_v9 = vsub.f32 %v3083_v62, %v3091_v8 }
 0xeef   :  { %v3096_v10 = vmul.f32 1.442695, %v3093_v9 }
 0xef0   :  { %v3342_v24 = vpop.permute.xlu1 %3341 }
 0xef1   :  { %4702 = vpow2.f32 %v3096_v10 }
 0xef4   :  { %v3340_v27 = vpop.permute.xlu1 %3339 }
 0xefb   :  { %v4703_v11 = vpop.eup %4702 }
 0xefc   :  { %v3088_v13 = vpop.xlane.xlu0 %3087  ;;  %v3101_v19 = vsel %vm253_vm2, %v4703_v11, 0.0 }
 0xefd   :  { %v3092_v20 = vsub.f32 %v3005_v4, %v3088_v13  ;;  %3102 = vadd.xlane.f32.xlu0 %v3101_v19 }
 0xeff   :  { %v3094_v38 = vmul.f32 1.442695, %v3092_v20 }
 0xf01   :  { %4704 = vpow2.f32 %v3094_v38 }
 0xf0b   :  { %v4705_v21 = vpop.eup %4704 }
 0xf0c   :  { %v3098_v42 = vsel %vm253_vm2, %v4705_v21, 0.0 }
 0xf0d   :  { %3099 = vadd.xlane.f32.xlu0 %v3098_v42 }
 0xf23   :  { %3419 = vrot.lane.b32.xlu0 %v5169_v37, %s4754_s2  ;;  %v3418_v37 = vpop.permute.xlu1 %3417 }
 0xf27   :  { %3517 = vrot.lane.b32.xlu0 %v5188_v40, %s4754_s2  ;;  %v3520_v31 = vpop.permute.xlu1 %3519 }
 0xf8a   :  { %v3103_v44 = vpop.xlane.xlu0 %3102 }
 0xf8b   :  { %4706 = vrcp.f32 %v3103_v44 }
 0xf95   :  { %v4707_v23 = vpop.eup %4706 }
 0xf96   :  { %v3107_v25 = vmul.f32 %v4707_v23, %v4703_v11 }
 0xf98   :  { %4497 = vmatmul.mubr.msk.f32.vlgmr.msra.gmra.mrb[42].mxu0 %vm253_vm2, %v3107_v25 }
 0xf99   :  { %4506 = vmatprep.mubr.msk.f32.mxu0 %vm4751_vm1, %v4750_v14 }
 0xf9a   :  { %v3100_v26 = vpop.xlane.xlu0 %3099 }
 0xf9b   :  { %4708 = vrcp.f32 %v3100_v26  ;;  %v3802_v26 = vld [vmem:[%s5495_s17] sm:$0xff] }
 0xf9e   :  { %v3420_v28 = vpop.permute.xlu0 %3419 }
 0xf9f   :  { %4505 = vmatpush3.xpose.msk.msra.mxu0 %vm253_vm2, %v3420_v28 }
 0xfa0   :  { %4514 = vmatprep.subr.mxu0 %v4750_v14 }
 0xfa2   :  { %4507 = vmatmul.mubr.msk.f32.vlgmr.msra.gmra.mrb[44].mxu0 %vm253_vm2, %v3418_v37  ;;  %v3518_v30 = vpop.permute.xlu0 %3517  ;;  %v3804_v37 = vld [vmem:[%s5495_s17 + $0x10] sm:$0xff] }
 0xfa3   :  { %4516 = vmatprep.mubr.msk.f32.mxu0 %vm4751_vm1, %v4750_v14 }
 0xfa5   :  { %v4709_v40 = vpop.eup %4708 }
 0xfa6   :  { %v3105_v29 = vmul.f32 %v4709_v40, %v4705_v21  ;;  %v3805_v40 = vld [vmem:[%s5495_s17 + $0x18] sm:$0xff] }
 0xfa8   :  { %4492 = vmatmul.mubr.msk.f32.vlgmr.msra.gmra.mrb[32].mxu1 %vm253_vm2, %v3105_v29  ;;  %v4606_v29 = vpack.c.bf16 %v3805_v40, %v3804_v37 }
 0xfa9   :  { %4500 = vmatpush3.xpose.msk.msra.mxu1 %vm253_vm2, %v3342_v24  ;;  %4501 = vmatprep.mubr.msk.f32.mxu1 %vm4751_vm1, %v4750_v14 }
 0xfaa   :  { %4509 = vmatprep.subr.mxu1 %v1946_v39 }
 0xfac   :  { %4502 = vmatmul.mubr.msk.f32.vlgmr.msra.gmra.mrb[34].mxu1 %vm253_vm2, %v3340_v27  ;;  %v3803_v27 = vld [vmem:[%s5495_s17 + $0x8] sm:$0xff] }
 0xfad   :  { %4511 = vmatprep.mubr.msk.f32.mxu1 %vm253_vm2, %v3518_v30  ;;  %4510 = vmatpush3.msra.mxu1 %v1946_v39  ;;  %v4602_v28 = vpack.c.bf16 %v3803_v27, %v3802_v26  ;;  %v3896_v30 = vld [vmem:[%s5497_s19] sm:$0xff]  ;;  %v3897_v39 = vld [vmem:[%s5497_s19 + $0x8] sm:$0xff] }
 0xfae   :  { %4519 = vmatprep.subr.mxu1 %v4750_v14 }
 0xfb0   :  { %4512 = vmatmul.mubr.msk.f32.vlgmr.msra.gmra.mrb[36].mxu1 %vm253_vm2, %v3520_v31  ;;  %v3898_v31 = vld [vmem:[%s5497_s19 + $0x10] sm:$0xff] }
 0xfb1   :  { %4521 = vmatprep.mubr.msk.f32.mxu1 %vm4751_vm1, %v4750_v14 }
0x106b   :  { %v3333_v32 = vpop.f32.mrb[42].mxu0 }
0x106c   :  { %v3338_v35 = vadd.f32 %v3333_v32, %v5306_v15  ;;  %v4498_v33 = vpop.f32.mrb[43].mxu0  ;;  %v4610_v32 = vpack.c.bf16 %v3897_v39, %v3896_v30 }
0x1075   :  { %v3491_v43 = vpop.f32.mrb[44].mxu0 }
0x1076   :  { %v3492_v45 = vadd.f32 %v5250_v60, %v3491_v43  ;;  %v4508_v46 = vpop.f32.mrb[45].mxu0  ;;  %v3900_v43 = vld [vmem:[%s5497_s19 + $0x20] sm:$0xff] }
0x1078   :  { %v3498_v47 = vsel %vm253_vm2, %v3492_v45, -inf }
0x1079   :  { %3499 = vmax.xlane.f32.xlu1 %v3498_v47  ;;  %v3902_v47 = vld [vmem:[%s5497_s19 + $0x30] sm:$0xff] }
0x107b   :  { %v3260_v48 = vpop.f32.mrb[32].mxu1 }
0x107c   :  { %v3337_v49 = vadd.f32 %v3260_v48, %v5310_v2  ;;  %v4493_v50 = vpop.f32.mrb[33].mxu1  ;;  %v3903_v48 = vld [vmem:[%s5497_s19 + $0x38] sm:$0xff] }
0x107d   :  { %v3904_v50 = vld [vmem:[%s5497_s19 + $0x40] sm:$0xff] }
0x107f   :  { %v3413_v51 = vpop.f32.mrb[34].mxu1 }
0x1080   :  { %v3414_v52 = vadd.f32 %v5242_v57, %v3413_v51  ;;  %v4503_v53 = vpop.f32.mrb[35].mxu1  ;;  %v3905_v51 = vld [vmem:[%s5497_s19 + $0x48] sm:$0xff] }
0x1081   :  { %v3906_v53 = vld [vmem:[%s5497_s19 + $0x50] sm:$0xff] }
0x1082   :  { %v3495_v14 = vsel %vm253_vm2, %v3414_v52, -inf }
0x1083   :  { %3496 = vmax.xlane.f32.xlu0 %v3495_v14  ;;  %v4513_v54 = vpop.f32.mrb[36].mxu1  ;;  %v3907_v14 = vld [vmem:[%s5497_s19 + $0x58] sm:$0xff] }
0x1084   :  { %v3591_v55 = vpop.f32.mrb[37].mxu1  ;;  %4520 = vmatpush3.msra.mxu1 %v4513_v54  ;;  %v4630_v54 = vpack.c.bf16 %v3907_v14, %v3906_v53 }
0x1085   :  { %4515 = vmatpush3.msra.mxu0 %v3591_v55  ;;  %4611 = vmatprep.subr.bf16.mxu1 %v4610_v32  ;;  %v3908_v55 = vld [vmem:[%s5497_s19 + $0x60] sm:$0xff] }
0x1086   :  { %4603 = vmatprep.subr.bf16.mxu0 %v4602_v28 }
0x1106   :  { %v3500_v60 = vpop.xlane.xlu1 %3499 }
0x1107   :  { %v3502_v56 = vsub.f32 %v3492_v45, %v3500_v60  ;;  %v3901_v45 = vld [vmem:[%s5497_s19 + $0x28] sm:$0xff] }
0x1108   :  { %v4618_v46 = vpack.c.bf16 %v3901_v45, %v3900_v43  ;;  %v3909_v60 = vld [vmem:[%s5497_s19 + $0x68] sm:$0xff] }
0x1109   :  { %v3505_v16 = vmul.f32 1.442695, %v3502_v56  ;;  %v4634_v56 = vpack.c.bf16 %v3909_v60, %v3908_v55 }
0x1110   :  { %v3497_v18 = vpop.xlane.xlu0 %3496 }
0x1111   :  { %v3501_v58 = vsub.f32 %v3414_v52, %v3497_v18  ;;  %v4626_v52 = vpack.c.bf16 %v3905_v51, %v3904_v50  ;;  %v4143_v51 = vld [vmem:[%s5500_s22] ss:$0 sm:$0xff] }
0x1113   :  { %v3503_v15 = vmul.f32 1.442695, %v3501_v58 }
0x1115   :  { %4710 = vpow2.f32 %v3503_v15 }
0x1116   :  { %4712 = vpow2.f32 %v3505_v16 }
0x111f   :  { %v4711_v59 = vpop.eup %4710 }
0x1120   :  { %v3507_v61 = vsel %vm253_vm2, %v4711_v59, 0.0  ;;  %v4713_v57 = vpop.eup %4712 }
0x1121   :  { %3508 = vadd.xlane.f32.xlu0 %v3507_v61  ;;  %v3510_v62 = vsel %vm253_vm2, %v4713_v57, 0.0 }
0x1125   :  { %3511 = vadd.xlane.f32.xlu0 %v3510_v62  ;;  %v4136_v62 = vld [vmem:[%s5493_s15] ss:$0 sm:$0xff] }
0x11ae   :  { %v3509_v63 = vpop.xlane.xlu0 %3508 }
0x11af   :  { %4714 = vrcp.f32 %v3509_v63 }
0x11b2   :  { %v3512_v0 = vpop.xlane.xlu0 %3511 }
0x11b3   :  { %4716 = vrcp.f32 %v3512_v0  ;;  %v4137_v0 = vld [vmem:[%s5494_s16] ss:$0 sm:$0xff] }
0x11b9   :  { %v4715_v5 = vpop.eup %4714 }
0x11ba   :  { %v3514_v1 = vmul.f32 %v4715_v5, %v4711_v59 }
0x11bc   :  { %4517 = vmatmul.mubr.msk.f32.vlgmr.msra.gmra.mrb[46].mxu0 %vm253_vm2, %v3514_v1 }
0x11bd   :  { %v4717_v12 = vpop.eup %4716  ;;  %4605 = vmatpush3.bf16.msra.mxu0 %v4602_v28 }
0x11be   :  { %v3516_v2 = vmul.f32 %v4717_v12, %v4713_v57  ;;  %4607 = vmatprep.subr.bf16.mxu0 %v4606_v29 }
0x11c0   :  { %4522 = vmatmul.mubr.msk.f32.vlgmr.msra.gmra.mrb[38].mxu1 %vm253_vm2, %v3516_v2 }
0x11c1   :  { %4609 = vmatpush3.bf16.msra.mxu0 %v4606_v29  ;;  %4613 = vmatpush3.bf16.msra.mxu1 %v4610_v32 }
0x128f   :  { %v3669_v3 = vpop.f32.mrb[46].mxu0 }
0x1290   :  { %v3746_v4 = vadd.f32 %v3669_v3, %v3337_v49  ;;  %v4518_v6 = vpop.f32.mrb[47].mxu0  ;;  %v4622_v49 = vpack.c.bf16 %v3903_v48, %v3902_v47  ;;  %v4142_v47 = vld [vmem:[%s5499_s21] ss:$0 sm:$0xff] }
0x1291   :  { %v3911_v6 = vld [vmem:[%s5497_s19 + $0x78] sm:$0xff] }
0x1292   :  { %v3754_v7 = vadd.f32 %v4135_v17, %v3746_v4  ;;  %v3910_v4 = vld [vmem:[%s5497_s19 + $0x70] sm:$0xff] }
0x1293   :  { %v3742_v8 = vpop.f32.mrb[38].mxu1 }
0x1294   :  { %v3747_v9 = vadd.f32 %v3742_v8, %v3338_v35  ;;  %v4523_v10 = vpop.f32.mrb[39].mxu1  ;;  %v3756_v11 = vadd.f32 %v3754_v7, %v5159_v34  ;;  %v3899_v35 = vld [vmem:[%s5497_s19 + $0x18] sm:$0xff]  ;;  %v4638_v7 = vpack.c.bf16 %v3911_v6, %v3910_v4  ;;  %v4138_v8 = vld [vmem:[%s5496_s18] ss:$0 sm:$0xff] }
0x1295   :  { %v4614_v33 = vpack.c.bf16 %v3899_v35, %v3898_v31 }
0x1296   :  { %v3755_v13 = vadd.f32 %v4135_v17, %v3747_v9  ;;  %v3760_v19 = vsel %vm96_vm0, %v3756_v11, 0.0 }
0x1297   :  { %3761 = vadd.xlane.f32.xlu1 %v3760_v19  ;;  %4615 = vmatprep.subr.bf16.mxu1 %v4614_v33 }
0x1298   :  { %v3757_v20 = vadd.f32 %v3755_v13, %v5163_v36  ;;  %4617 = vmatpush3.bf16.msra.mxu1 %v4614_v33 }
0x1299   :  { %4619 = vmatprep.subr.bf16.mxu1 %v4618_v46 }
0x129a   :  { %v3763_v38 = vsel %vm96_vm0, %v3757_v20, 0.0 }
0x129b   :  { %3764 = vadd.xlane.f32.xlu0 %v3763_v38  ;;  %v4141_v38 = vld [vmem:[%s5498_s20] ss:$0 sm:$0xff] }
0x129c   :  { %4621 = vmatpush3.bf16.msra.mxu1 %v4618_v46 }
0x129d   :  { %4623 = vmatprep.subr.bf16.mxu1 %v4622_v49 }
0x12a0   :  { %4625 = vmatpush3.bf16.msra.mxu1 %v4622_v49 }
0x12a1   :  { %4627 = vmatprep.subr.bf16.mxu1 %v4626_v52 }
0x12a4   :  { %4629 = vmatpush3.bf16.msra.mxu1 %v4626_v52 }
0x12a5   :  { %4631 = vmatprep.subr.bf16.mxu1 %v4630_v54 }
0x12a8   :  { %4633 = vmatpush3.bf16.msra.mxu1 %v4630_v54 }
0x12a9   :  { %4635 = vmatprep.subr.bf16.mxu1 %v4634_v56 }
0x12ac   :  { %4637 = vmatpush3.bf16.msra.mxu1 %v4634_v56 }
0x12ad   :  { %4639 = vmatprep.subr.bf16.mxu1 %v4638_v7 }
0x12b0   :  { %4641 = vmatpush3.bf16.msra.mxu1 %v4638_v7 }
0x1324   :  { %v3762_v21 = vpop.xlane.xlu1 %3761 }
0x1325   :  { %v3766_v42 = vmul.f32 0.03125, %v3762_v21 }
0x1327   :  { %v5368_v41 = vsub.f32 %v3756_v11, %v3766_v42 }
0x1328   :  { %v3765_v22 = vpop.xlane.xlu0 %3764 }
0x1329   :  { %v3767_v44 = vmul.f32 0.03125, %v3765_v22  ;;  %v3770_v23 = vmul.f32 %v5368_v41, %v5368_v41 }
0x132b   :  { %v5372_v24 = vsub.f32 %v3757_v20, %v3767_v44  ;;  %v3772_v34 = vsel %vm96_vm0, %v3770_v23, 0.0 }
0x132c   :  { %3773 = vadd.xlane.f32.xlu1 %v3772_v34 }
0x132d   :  { %v3771_v36 = vmul.f32 %v5372_v24, %v5372_v24 }
0x132f   :  { %v3775_v25 = vsel %vm96_vm0, %v3771_v36, 0.0 }
0x1330   :  { %3776 = vadd.xlane.f32.xlu0 %v3775_v25 }
0x13b9   :  { %v3774_v18 = vpop.xlane.xlu1 %3773 }
0x13ba   :  { %v3778_v58 = vmul.f32 0.03125, %v3774_v18 }
0x13bc   :  { %v3780_v16 = vadd.f32 1e-05, %v3778_v58 }
0x13bd   :  { %v3777_v15 = vpop.xlane.xlu0 %3776 }
0x13be   :  { %4718 = vrsqrt.f32 %v3780_v16  ;;  %v3779_v59 = vmul.f32 0.03125, %v3777_v15 }
0x13c0   :  { %v3781_v61 = vadd.f32 1e-05, %v3779_v59 }
0x13c2   :  { %4720 = vrsqrt.f32 %v3781_v61 }
0x13c8   :  { %v4719_v57 = vpop.eup %4718 }
0x13c9   :  { %v3784_v63 = vmul.f32 %v4719_v57, %v5368_v41 }
0x13cb   :  { %v3792_v5 = vmul.f32 %v4136_v62, %v3784_v63 }
0x13cc   :  { %v4721_v1 = vpop.eup %4720 }
0x13cd   :  { %v3785_v12 = vmul.f32 %v4721_v1, %v5372_v24  ;;  %v3800_v2 = vadd.f32 %v4137_v0, %v3792_v5 }
0x13cf   :  { %v3793_v17 = vmul.f32 %v4136_v62, %v3785_v12  ;;  %4532 = vmatprep.mubr.msk.f32.mxu0 %vm96_vm0, %v3800_v2 }
0x13d1   :  { %v3801_v3 = vadd.f32 %v4137_v0, %v3793_v17 }
0x13d3   :  { %4533 = vmatmul.mubr.msk.f32.vlgmr.msra.gmra.mrb[48].mxu0 %vm96_vm0, %v3801_v3 }
0x14a6   :  { %v4534_v9 = vpop.f32.mrb[48].mxu0 }
0x14a7   :  { %v3891_v10 = vadd.f32 %v4534_v9, %v4138_v8  ;;  %v3885_v11 = vpop.f32.mrb[49].mxu0 }
0x14a8   :  { %v3886_v13 = vadd.f32 %v4138_v8, %v3885_v11 }
0x14a9   :  { %v3895_v20 = vmax.f32 %v3891_v10, 0.0 }
0x14aa   :  { %v3894_v19 = vmax.f32 %v3886_v13, 0.0 }
0x14ac   :  { %4567 = vmatprep.mubr.f32.mxu1 %v3894_v19 }
0x14ad   :  { %4568 = vmatmul.mubr.f32.vlgmr.msra.gmra.mrb[40].mxu1 %v3895_v20 }
0x1580   :  { %v4569_v21 = vpop.f32.mrb[40].mxu1 }
0x1581   :  { %v3991_v42 = vadd.f32 %v4569_v21, %v4141_v38  ;;  %v3985_v41 = vpop.f32.mrb[41].mxu1 }
0x1582   :  { %v3986_v22 = vadd.f32 %v4141_v38, %v3985_v41 }
0x1583   :  { %v3995_v44 = vadd.f32 %v3991_v42, %v3801_v3 }
0x1584   :  { %v3994_v23 = vadd.f32 %v3986_v22, %v3800_v2 }
0x1585   :  { %v4001_v24 = vsel %vm96_vm0, %v3995_v44, 0.0 }
0x1586   :  { %4002 = vadd.xlane.f32.xlu0 %v4001_v24  ;;  %v3998_v34 = vsel %vm96_vm0, %v3994_v23, 0.0 }
0x1587   :  { %3999 = vadd.xlane.f32.xlu1 %v3998_v34 }
0x1613   :  { %v4003_v36 = vpop.xlane.xlu0 %4002 }
0x1614   :  { %v4005_v25 = vmul.f32 0.03125, %v4003_v36  ;;  %v4000_v26 = vpop.xlane.xlu1 %3999 }
0x1615   :  { %v4004_v27 = vmul.f32 0.03125, %v4000_v26 }
0x1616   :  { %v4007_v28 = vsub.f32 %v3995_v44, %v4005_v25 }
0x1617   :  { %v4006_v37 = vsub.f32 %v3994_v23, %v4004_v27 }
0x1618   :  { %v4009_v40 = vmul.f32 %v4007_v28, %v4007_v28 }
0x1619   :  { %v4008_v29 = vmul.f32 %v4006_v37, %v4006_v37 }
0x161a   :  { %v4013_v30 = vsel %vm96_vm0, %v4009_v40, 0.0 }
0x161b   :  { %4014 = vadd.xlane.f32.xlu0 %v4013_v30  ;;  %v4010_v39 = vsel %vm96_vm0, %v4008_v29, 0.0 }
0x161c   :  { %4011 = vadd.xlane.f32.xlu1 %v4010_v39 }
0x16a8   :  { %v4015_v31 = vpop.xlane.xlu0 %4014 }
0x16a9   :  { %v4017_v32 = vmul.f32 0.03125, %v4015_v31  ;;  %v4012_v35 = vpop.xlane.xlu1 %4011 }
0x16aa   :  { %v4016_v33 = vmul.f32 0.03125, %v4012_v35 }
0x16ab   :  { %v4019_v43 = vadd.f32 1e-05, %v4017_v32 }
0x16ac   :  { %v4018_v45 = vadd.f32 1e-05, %v4016_v33 }
0x16ad   :  { %4722 = vrsqrt.f32 %v4019_v43 }
0x16ae   :  { %4724 = vrsqrt.f32 %v4018_v45 }
0x16b7   :  { %v4723_v46 = vpop.eup %4722 }
0x16b8   :  { %v4725_v48 = vpop.eup %4724  ;;  %v4023_v49 = vmul.f32 %v4723_v46, %v4007_v28 }
0x16b9   :  { %v4022_v50 = vmul.f32 %v4725_v48, %v4006_v37 }
0x16ba   :  { %v4031_v52 = vmul.f32 %v4142_v47, %v4023_v49 }
0x16bb   :  { %v4030_v53 = vmul.f32 %v4142_v47, %v4022_v50 }
0x16bc   :  { %v4039_v14 = vadd.f32 %v4143_v51, %v4031_v52 }
0x16bd   :  { %v4038_v54 = vadd.f32 %v4143_v51, %v4030_v53 }
0x16be   :  { %4041 = vst.msk [vmem:[#allocation2 + $0x8] sm:$0xff] %vm96_vm0, %v4039_v14 }
0x16bf   :  { %4040 = vst.msk [vmem:[#allocation2] sm:$0xff] %vm96_vm0, %v4038_v54 }
0x16c0   :  { %4737 = shalt.err (!%p4734_p4)
}
0x16c1   :  { %s4738_s7 = scalar_lea.hbm %s5501_s23, 256 }
0x16c2   :  { %p4739_p5 = scmp.ne.s32.totalorder %s5501_s23, %s4738_s7  ;;  %p4742_p6 = scmp.lt.u32.totalorder %s4738_s7, %s5501_s23 }
0x16c4   :  { %p4744_p7 = pnand %p4742_p6, %p4739_p5 }
0x16c6   :  { %4747 = shalt.err (!%p4744_p7)
}
0x16c7   :  { %s4756_s0 = smov 128   ;;  %s4757_s12 = smov 8  }
0x16c8   :  { %4053 = dma.vmem_to_hbm [thread:$0]  %s4048_s9, 256, %s5501_s23, [#allocation3], %s4756_s0, %s4756_s0, %s4757_s12  }
0x16c9   :  { %4748 = dma.done.wait [#allocation3], 256  }
0x16ca   :  { %4749 = vsyncadd [#allocation3], 4294967040 }
0x16cb   :  { %4057 = vsyncpa [#allocation3], 1 }

</bundles_post_ra>
